<compile_context>
chip_gen: v7x
topology: tpu7x:2x2x1
jax: 0.10.0
libtpu: 0.0.40
codegen_flags: <defaults>
</compile_context>

<pallas_src>
import functools
import numpy as np

import jax
import jax.numpy as jnp
from jax import lax
from jax.experimental import pallas as pl
from jax.experimental.pallas import tpu as pltpu


_NEG_SLOPE = 0.01          # LeakyReLU negative_slope (module default)
_BN_EPS = 1e-5             # BatchNorm eps (module default)


# ----------------------------------------------------------------------------
# In-kernel helpers (pure value computation; all reshapes keep the lane dim)
# ----------------------------------------------------------------------------

def _upsample2x_rows(x):
    """2x bilinear (align_corners=False) upsample along axis 0 of (H, W, C)."""
    prev = jnp.concatenate([x[:1], x[:-1]], axis=0)      # clamped x[i-1]
    nxt = jnp.concatenate([x[1:], x[-1:]], axis=0)       # clamped x[i+1]
    even = 0.25 * prev + 0.75 * x                        # output row 2i
    odd = 0.75 * x + 0.25 * nxt                          # output row 2i+1
    h, w, c = x.shape
    return jnp.stack([even, odd], axis=1).reshape(2 * h, w, c)


def _upsample2x_cols_flat(xf, n_rows, n_cols):
    """2x bilinear upsample along the column axis of a row-major flattened
    (n_rows*n_cols, C) image; returns (n_rows*2*n_cols, C)."""
    col = lax.broadcasted_iota(jnp.int32, (n_rows, n_cols, 1), 1)
    col = col.reshape(n_rows * n_cols, 1)
    shift_dn = jnp.concatenate([xf[:1], xf[:-1]], axis=0)
    shift_up = jnp.concatenate([xf[1:], xf[-1:]], axis=0)
    prev = jnp.where(col == 0, xf, shift_dn)             # clamped x[., j-1]
    nxt = jnp.where(col == n_cols - 1, xf, shift_up)     # clamped x[., j+1]
    even = 0.25 * prev + 0.75 * xf
    odd = 0.75 * xf + 0.25 * nxt
    c = xf.shape[1]
    return jnp.stack([even, odd], axis=1).reshape(2 * n_rows * n_cols, c)


def _conv3x3_fused(xf, rows, cols, row_idx, col_idx, w_ref, sh_ref):
    """3x3 'same' conv + folded (conv-bias + eval-BN) + LeakyReLU on a
    row-major flattened (rows*cols, Cin) image.  Halo handled via iota masks
    (no padded copy); one im2col MXU matmul with K = 9*Cin."""
    cin = xf.shape[1]
    pad = cols + 1
    zpad = jnp.zeros((pad, cin), xf.dtype)
    xfp = jnp.concatenate([zpad, xf, zpad], axis=0)      # VMEM-only guard band
    taps = []
    for dy in range(3):
        for dx in range(3):
            off = (dy - 1) * cols + (dx - 1)
            tap = xfp[pad + off: pad + off + rows * cols]
            rr = row_idx + (dy - 1)
            cc = col_idx + (dx - 1)
            valid = (rr >= 0) & (rr < rows) & (cc >= 0) & (cc < cols)
            taps.append(jnp.where(valid, tap, 0.0))
    patches = jnp.concatenate(taps, axis=-1)             # (rows*cols, 9*Cin)
    y = jnp.dot(patches, w_ref[...], preferred_element_type=jnp.float32)
    y = y + sh_ref[...]                                  # folded bias + BatchNorm
    return jnp.where(y >= 0.0, y, _NEG_SLOPE * y)        # LeakyReLU


# ----------------------------------------------------------------------------
# Fused per-stage kernel
# ----------------------------------------------------------------------------

def _stage_kernel(x_ref, skip_ref, w1_ref, sh1_ref, w2_ref, sh2_ref, *rest,
                  has_seg):
    # x_ref:    (1, H, W, Cx)    low-res input for this stage
    # skip_ref: (1, 2H*2W, Cs)   skip connection, pre-flattened row-major
    # w*_ref:   (9*Cin, Cout)    conv weights with bias+BN folded in
    # sh*_ref:  (1, Cout)        folded per-channel shift
    # wseg_ref: (K, C2)          1x1 seg conv weights (last stage only)
    if has_seg:
        wseg_ref, o_ref = rest
    else:
        (o_ref,) = rest

    _, H, W, _ = x_ref.shape
    P, Q = 2 * H, 2 * W

    # --- 2x bilinear upsample (separable 0.25/0.75 stencil) -------------------
    up = _upsample2x_rows(x_ref[0])                              # (P, W, Cx)
    up_flat = _upsample2x_cols_flat(up.reshape(P * W, up.shape[2]), P, W)

    # --- concat with skip (never leaves VMEM) ---------------------------------
    cat = jnp.concatenate([up_flat, skip_ref[0]], axis=-1)       # (P*Q, Cx+Cs)

    # --- two fused Conv3x3 + (Dropout eval no-op) + BN + LeakyReLU blocks -----
    row_idx = lax.broadcasted_iota(jnp.int32, (P, Q, 1), 0).reshape(P * Q, 1)
    col_idx = lax.broadcasted_iota(jnp.int32, (P, Q, 1), 1).reshape(P * Q, 1)
    y1 = _conv3x3_fused(cat, P, Q, row_idx, col_idx, w1_ref, sh1_ref)
    y2 = _conv3x3_fused(y1, P, Q, row_idx, col_idx, w2_ref, sh2_ref)

    if has_seg:
        # 1x1 seg conv + softmax over classes, emitted lane-dense as (K, P*Q).
        logits = lax.dot_general(wseg_ref[...], y2,
                                 dimension_numbers=(((1,), (1,)), ((), ())),
                                 preferred_element_type=jnp.float32)  # (K, P*Q)
        m = jnp.max(logits, axis=0, keepdims=True)
        e = jnp.exp(logits - m)
        denom = jnp.sum(e, axis=0, keepdims=True)
        o_ref[0] = (e * pl.reciprocal(denom, approx=True)).astype(o_ref.dtype)
    else:
        o_ref[0] = y2.astype(o_ref.dtype)                        # (P*Q, C2)


# ----------------------------------------------------------------------------
# pallas_call wrapper (grid over batch, whole image per grid step)
# ----------------------------------------------------------------------------

def _batch_spec(shape):
    nd = len(shape)
    return pl.BlockSpec((1,) + tuple(shape[1:]),
                        lambda n, _nd=nd: (n,) + (0,) * (_nd - 1))


def _full_spec(shape):
    nd = len(shape)
    return pl.BlockSpec(tuple(shape), lambda n, _nd=nd: (0,) * _nd)


def _run_stage(x_nhwc, skip_flat, stage_params, wseg):
    """One decoder stage fused in a single pallas_call."""
    N, H, W, _ = x_nhwc.shape
    P, Q = 2 * H, 2 * W
    C2 = stage_params["w2"].shape[1]
    has_seg = wseg is not None

    args = [x_nhwc, skip_flat, stage_params["w1"], stage_params["sh1"],
            stage_params["w2"], stage_params["sh2"]]
    in_specs = [_batch_spec(x_nhwc.shape), _batch_spec(skip_flat.shape),
                _full_spec(stage_params["w1"].shape),
                _full_spec(stage_params["sh1"].shape),
                _full_spec(stage_params["w2"].shape),
                _full_spec(stage_params["sh2"].shape)]
    if has_seg:
        args.append(wseg)
        in_specs.append(_full_spec(wseg.shape))
        out_shape = jax.ShapeDtypeStruct((N, wseg.shape[0], P * Q), x_nhwc.dtype)
    else:
        out_shape = jax.ShapeDtypeStruct((N, P * Q, C2), x_nhwc.dtype)
    out_spec = _batch_spec(out_shape.shape)

    kernel = functools.partial(_stage_kernel, has_seg=has_seg)
    # TODO(synk): for full-resolution nnU-Net inputs add a spatial (row-tile)
    # grid axis with halo handling so per-step blocks fit v7x's smaller VMEM.
    return pl.pallas_call(
        kernel,
        out_shape=out_shape,
        grid=(N,),
        in_specs=in_specs,
        out_specs=out_spec,
        compiler_params=pltpu.CompilerParams(
            dimension_semantics=("parallel",),
            vmem_limit_bytes=48 * 1024 * 1024),
    )(*args)


# ----------------------------------------------------------------------------
# Parameters: raw (PyTorch-like) params + folded kernel params
# ----------------------------------------------------------------------------

def _make_raw_conv_block(key, cin, cout):
    kw, kb, kg, kbt, km, kv = jax.random.split(key, 6)
    w = jax.random.normal(kw, (cout, cin, 3, 3), jnp.float32) * np.sqrt(2.0 / (cin * 9))
    return dict(
        w=w,
        b=0.01 * jax.random.normal(kb, (cout,), jnp.float32),
        gamma=1.0 + 0.1 * jax.random.normal(kg, (cout,), jnp.float32),
        beta=0.1 * jax.random.normal(kbt, (cout,), jnp.float32),
        rmean=0.1 * jax.random.normal(km, (cout,), jnp.float32),
        rvar=jax.random.uniform(kv, (cout,), jnp.float32, minval=0.5, maxval=1.5),
    )


def build_decoder_params(key, final_num_features, context_channels,
                         input_channels, num_classes, num_pool):
    """Mirrors the channel wiring of decoder.__init__
    (convolutional_upsampling=False, num_conv_per_stage=2)."""
    raw = {"stages": [], "seg": []}
    for u in range(num_pool):
        nfeat_skip = context_channels[-(2 + u)]
        n_concat = nfeat_skip * 2
        out2 = context_channels[-(3 + u)] if u != num_pool - 1 else input_channels
        key, k1, k2 = jax.random.split(key, 3)
        blk_a = _make_raw_conv_block(k1, n_concat, nfeat_skip)
        blk_b = _make_raw_conv_block(k2, nfeat_skip, out2)
        raw["stages"].append((blk_a, blk_b, out2))
    for u in range(num_pool):
        out2 = raw["stages"][u][2]
        key, ks = jax.random.split(key)
        raw["seg"].append(0.1 * jax.random.normal(ks, (num_classes, out2), jnp.float32))
    return raw


def _fold_conv_block(blk):
    """Fold conv bias + eval-mode BatchNorm into the weights:
       y = LeakyReLU(conv(x, w * scale) + (b * scale + shift))."""
    scale = blk["gamma"] / jnp.sqrt(blk["rvar"] + _BN_EPS)
    shift = blk["beta"] - blk["rmean"] * scale
    cout, cin = blk["w"].shape[0], blk["w"].shape[1]
    w9 = jnp.transpose(blk["w"], (2, 3, 1, 0)).reshape(9 * cin, cout)  # tap-major
    return w9 * scale[None, :], (blk["b"] * scale + shift).reshape(1, cout)


def prepare_kernel_params(raw):
    kp = {"stages": [], "seg": list(raw["seg"])}
    for blk_a, blk_b, _ in raw["stages"]:
        w1, sh1 = _fold_conv_block(blk_a)
        w2, sh2 = _fold_conv_block(blk_b)
        kp["stages"].append(dict(w1=w1, sh1=sh1, w2=w2, sh2=sh2))
    return kp


# ----------------------------------------------------------------------------
# Decoder forward (Pallas) + pure-JAX reference
# ----------------------------------------------------------------------------

def decoder_forward(kparams, x_nchw, skips_nchw):
    """Pallas decoder forward.  Accepts / returns NCHW to match PyTorch."""
    x = jnp.transpose(x_nchw, (0, 2, 3, 1))                       # -> NHWC
    skips = [jnp.transpose(s, (0, 2, 3, 1)) for s in skips_nchw]
    num_pool = len(kparams["stages"])
    for u in range(num_pool):
        skip = skips[-(u + 1)]
        N, H, W, _ = x.shape
        Ns, P, Q, Cs = skip.shape
        # adjust_to_size: with exact 2x pooling factors shapes already match.
        # TODO(synk): general crop/pad path of adjust_to_size omitted (no-op here).
        assert (P, Q) == (2 * H, 2 * W)
        stage = kparams["stages"][u]
        last = (u == num_pool - 1)
        wseg = kparams["seg"][u] if last else None
        y = _run_stage(x, skip.reshape(Ns, P * Q, Cs), stage, wseg)
        if last:
            # seg head already lane-dense (K, H*W): reshape straight to NCHW.
            return y.reshape(N, wseg.shape[0], P, Q)
        x = y.reshape(N, P, Q, stage["w2"].shape[1])
    return None


def _interp_matrix_1d(n_in, n_out):
    # PyTorch bilinear interpolate, align_corners=False (reference only).
    o = np.arange(n_out, dtype=np.float64)
    src = np.clip((o + 0.5) * (n_in / n_out) - 0.5, 0.0, n_in - 1)
    i0 = np.floor(src).astype(np.int64)
    i1 = np.minimum(i0 + 1, n_in - 1)
    frac = src - i0
    M = np.zeros((n_out, n_in), np.float32)
    M[np.arange(n_out), i0] += (1.0 - frac)
    M[np.arange(n_out), i1] += frac
    return M


def make_upsample_matrix(h, w):
    uh = _interp_matrix_1d(h, 2 * h)
    uw = _interp_matrix_1d(w, 2 * w)
    return jnp.asarray(np.kron(uh, uw))     # reference only (toy sizes)


def decoder_forward_ref(raw, x_nchw, skips_nchw):
    """Pure-JAX reference implementing the unfused original math."""
    hp = lax.Precision.HIGHEST
    x = jnp.transpose(x_nchw, (0, 2, 3, 1))
    skips = [jnp.transpose(s, (0, 2, 3, 1)) for s in skips_nchw]
    for u, (blk_a, blk_b, _) in enumerate(raw["stages"]):
        skip = skips[-(u + 1)]
        N, H, W, C = x.shape
        m = make_upsample_matrix(H, W)
        x = jnp.einsum("pk,nkc->npc", m, x.reshape(N, H * W, C),
                       precision=hp).reshape(N, 2 * H, 2 * W, C)
        x = jnp.concatenate([x, skip], axis=-1)
        for blk in (blk_a, blk_b):
            w = jnp.transpose(blk["w"], (2, 3, 1, 0))             # OIHW -> HWIO
            y = lax.conv_general_dilated(
                x, w, (1, 1), "SAME",
                dimension_numbers=("NHWC", "HWIO", "NHWC"), precision=hp)
            y = y + blk["b"]
            scale = blk["gamma"] / jnp.sqrt(blk["rvar"] + _BN_EPS)
            y = y * scale + (blk["beta"] - blk["rmean"] * scale)
            x = jnp.where(y >= 0.0, y, _NEG_SLOPE * y)
    logits = jnp.einsum("nhwc,kc->nhwk", x, raw["seg"][-1], precision=hp)
    return jnp.transpose(jax.nn.softmax(logits, axis=-1), (0, 3, 1, 2))


# ----------------------------------------------------------------------------

if __name__ == "__main__":
    key = jax.random.PRNGKey(0)

    # Small synthetic config consistent with the module's constructor wiring.
    input_channels = 4                 # BraTS modalities -> final conv block output
    num_classes = 3
    num_pool = 2
    context_channels = [8, 16, 16]     # encoder stage output channels (bottleneck last)
    final_num_features = context_channels[-1]

    N = 2
    H_full = 16
    Hb = H_full // (2 ** num_pool)     # bottleneck spatial = 4

    kx, ks0, ks1, kp = jax.random.split(key, 4)
    x = jax.random.normal(kx, (N, final_num_features, Hb, Hb), jnp.float32)
    skip0 = jax.random.normal(ks0, (N, context_channels[0], H_full, H_full), jnp.float32)
    skip1 = jax.random.normal(ks1, (N, context_channels[1], H_full // 2, H_full // 2),
                              jnp.float32)
    skips = [skip0, skip1]             # skip_info as produced by the encoder

    raw_params = build_decoder_params(kp, final_num_features, context_channels,
                                      input_channels, num_classes, num_pool)
    kernel_params = prepare_kernel_params(raw_params)

    out = decoder_forward(kernel_params, x, skips)
    out = jax.block_until_ready(out)
    assert out.shape == (N, num_classes, H_full, H_full), out.shape

    ref = decoder_forward_ref(raw_params, x, skips)
    np.testing.assert_allclose(np.asarray(out), np.asarray(ref), rtol=2e-3, atol=2e-3)

    print("KERNEL_OK")
</pallas_src>

<mosaic_0001>
module attributes {stable_mosaic.version = 11 : i64} {
  func.func @_stage_kernel(%arg0: i32, %arg1: memref<1x4x4x16xf32, #tpu.memory_space<vmem>>, %arg2: memref<1x64x16xf32, #tpu.memory_space<vmem>>, %arg3: memref<288x16xf32, #tpu.memory_space<vmem>>, %arg4: memref<1x16xf32, #tpu.memory_space<vmem>>, %arg5: memref<144x8xf32, #tpu.memory_space<vmem>>, %arg6: memref<1x8xf32, #tpu.memory_space<vmem>>, %arg7: memref<1x64x8xf32, #tpu.memory_space<vmem>>) attributes {dimension_semantics = [#tpu.dimension_semantics<parallel>], iteration_bounds = array<i64: 2>, scalar_prefetch = 0 : i64, scratch_operands = 0 : i64, tpu.core_type = #tpu.core_type<tc>, window_params = [{transform_indices = @transform_0, window_bounds = array<i64: 1, 4, 4, 16>}, {transform_indices = @transform_1, window_bounds = array<i64: 1, 64, 16>}, {pipeline_mode = #tpu.pipeline_mode<synchronous>, transform_indices = @transform_2, window_bounds = array<i64: 288, 16>}, {pipeline_mode = #tpu.pipeline_mode<synchronous>, transform_indices = @transform_3, window_bounds = array<i64: 1, 16>}, {pipeline_mode = #tpu.pipeline_mode<synchronous>, transform_indices = @transform_4, window_bounds = array<i64: 144, 8>}, {pipeline_mode = #tpu.pipeline_mode<synchronous>, transform_indices = @transform_5, window_bounds = array<i64: 1, 8>}, {transform_indices = @transform_6, window_bounds = array<i64: 1, 64, 8>}]} {
    %c0 = arith.constant 0 : index
    %c0_0 = arith.constant 0 : index
    %c0_1 = arith.constant 0 : index
    %c0_2 = arith.constant 0 : index
    %0 = vector.load %arg1[%c0, %c0_0, %c0_1, %c0_2] : memref<1x4x4x16xf32, #tpu.memory_space<vmem>>, vector<1x4x4x16xf32>
    %1 = vector.shape_cast %0 : vector<1x4x4x16xf32> to vector<4x4x16xf32>
    %2 = vector.extract_strided_slice %1 {offsets = [0, 0, 0], sizes = [1, 4, 16], strides = [1, 1, 1]} : vector<4x4x16xf32> to vector<1x4x16xf32>
    %3 = vector.extract_strided_slice %1 {offsets = [0, 0, 0], sizes = [3, 4, 16], strides = [1, 1, 1]} : vector<4x4x16xf32> to vector<3x4x16xf32>
    %4 = tpu.concatenate %2, %3 in 0 : vector<1x4x16xf32>, vector<3x4x16xf32> -> vector<4x4x16xf32>
    %5 = vector.extract_strided_slice %1 {offsets = [1, 0, 0], sizes = [3, 4, 16], strides = [1, 1, 1]} : vector<4x4x16xf32> to vector<3x4x16xf32>
    %6 = vector.extract_strided_slice %1 {offsets = [3, 0, 0], sizes = [1, 4, 16], strides = [1, 1, 1]} : vector<4x4x16xf32> to vector<1x4x16xf32>
    %7 = tpu.concatenate %5, %6 in 0 : vector<3x4x16xf32>, vector<1x4x16xf32> -> vector<4x4x16xf32>
    %cst = arith.constant 2.500000e-01 : f32
    %8 = vector.broadcast %cst : f32 to vector<4x4x16xf32>
    %9 = arith.mulf %8, %4 : vector<4x4x16xf32>
    %cst_3 = arith.constant 7.500000e-01 : f32
    %10 = vector.broadcast %cst_3 : f32 to vector<4x4x16xf32>
    %11 = arith.mulf %10, %1 : vector<4x4x16xf32>
    %12 = arith.addf %9, %11 : vector<4x4x16xf32>
    %cst_4 = arith.constant 7.500000e-01 : f32
    %13 = vector.broadcast %cst_4 : f32 to vector<4x4x16xf32>
    %14 = arith.mulf %13, %1 : vector<4x4x16xf32>
    %cst_5 = arith.constant 2.500000e-01 : f32
    %15 = vector.broadcast %cst_5 : f32 to vector<4x4x16xf32>
    %16 = arith.mulf %15, %7 : vector<4x4x16xf32>
    %17 = arith.addf %14, %16 : vector<4x4x16xf32>
    %18 = vector.shape_cast %12 : vector<4x4x16xf32> to vector<4x1x4x16xf32>
    %19 = vector.shape_cast %17 : vector<4x4x16xf32> to vector<4x1x4x16xf32>
    %20 = tpu.concatenate %18, %19 in 1 : vector<4x1x4x16xf32>, vector<4x1x4x16xf32> -> vector<4x2x4x16xf32>
    %21 = vector.shape_cast %20 : vector<4x2x4x16xf32> to vector<8x4x16xf32>
    %22 = vector.shape_cast %21 : vector<8x4x16xf32> to vector<32x16xf32>
    %23 = tpu.iota {dimensions = array<i32: 1>} : vector<8x4x1xi32>
    %24 = vector.shape_cast %23 : vector<8x4x1xi32> to vector<32x1xi32>
    %25 = vector.extract_strided_slice %22 {offsets = [0, 0], sizes = [1, 16], strides = [1, 1]} : vector<32x16xf32> to vector<1x16xf32>
    %26 = vector.extract_strided_slice %22 {offsets = [0, 0], sizes = [31, 16], strides = [1, 1]} : vector<32x16xf32> to vector<31x16xf32>
    %27 = tpu.concatenate %25, %26 in 0 : vector<1x16xf32>, vector<31x16xf32> -> vector<32x16xf32>
    %28 = vector.extract_strided_slice %22 {offsets = [1, 0], sizes = [31, 16], strides = [1, 1]} : vector<32x16xf32> to vector<31x16xf32>
    %29 = vector.extract_strided_slice %22 {offsets = [31, 0], sizes = [1, 16], strides = [1, 1]} : vector<32x16xf32> to vector<1x16xf32>
    %30 = tpu.concatenate %28, %29 in 0 : vector<31x16xf32>, vector<1x16xf32> -> vector<32x16xf32>
    %c0_i32 = arith.constant 0 : i32
    %31 = vector.broadcast %c0_i32 : i32 to vector<32x1xi32>
    %32 = arith.cmpi eq, %24, %31 : vector<32x1xi32>
    %33 = vector.shape_cast %32 : vector<32x1xi1> to vector<32x1xi1>
    %34 = vector.broadcast %33 : vector<32x1xi1> to vector<32x16xi1>
    %35 = arith.select %34, %22, %27 : vector<32x16xi1>, vector<32x16xf32>
    %c3_i32 = arith.constant 3 : i32
    %36 = vector.broadcast %c3_i32 : i32 to vector<32x1xi32>
    %37 = arith.cmpi eq, %24, %36 : vector<32x1xi32>
    %38 = vector.shape_cast %37 : vector<32x1xi1> to vector<32x1xi1>
    %39 = vector.broadcast %38 : vector<32x1xi1> to vector<32x16xi1>
    %40 = arith.select %39, %22, %30 : vector<32x16xi1>, vector<32x16xf32>
    %cst_6 = arith.constant 2.500000e-01 : f32
    %41 = vector.broadcast %cst_6 : f32 to vector<32x16xf32>
    %42 = arith.mulf %41, %35 : vector<32x16xf32>
    %cst_7 = arith.constant 7.500000e-01 : f32
    %43 = vector.broadcast %cst_7 : f32 to vector<32x16xf32>
    %44 = arith.mulf %43, %22 : vector<32x16xf32>
    %45 = arith.addf %42, %44 : vector<32x16xf32>
    %cst_8 = arith.constant 7.500000e-01 : f32
    %46 = vector.broadcast %cst_8 : f32 to vector<32x16xf32>
    %47 = arith.mulf %46, %22 : vector<32x16xf32>
    %cst_9 = arith.constant 2.500000e-01 : f32
    %48 = vector.broadcast %cst_9 : f32 to vector<32x16xf32>
    %49 = arith.mulf %48, %40 : vector<32x16xf32>
    %50 = arith.addf %47, %49 : vector<32x16xf32>
    %51 = vector.shape_cast %45 : vector<32x16xf32> to vector<32x1x16xf32>
    %52 = vector.shape_cast %50 : vector<32x16xf32> to vector<32x1x16xf32>
    %53 = tpu.concatenate %51, %52 in 1 : vector<32x1x16xf32>, vector<32x1x16xf32> -> vector<32x2x16xf32>
    %54 = vector.shape_cast %53 : vector<32x2x16xf32> to vector<64x16xf32>
    %c0_10 = arith.constant 0 : index
    %c0_11 = arith.constant 0 : index
    %c0_12 = arith.constant 0 : index
    %55 = vector.load %arg2[%c0_10, %c0_11, %c0_12] : memref<1x64x16xf32, #tpu.memory_space<vmem>>, vector<1x64x16xf32>
    %56 = vector.shape_cast %55 : vector<1x64x16xf32> to vector<64x16xf32>
    %57 = tpu.concatenate %54, %56 in 1 : vector<64x16xf32>, vector<64x16xf32> -> vector<64x32xf32>
    %58 = tpu.iota {dimensions = array<i32: 0>} : vector<8x8x1xi32>
    %59 = vector.shape_cast %58 : vector<8x8x1xi32> to vector<64x1xi32>
    %60 = tpu.iota {dimensions = array<i32: 1>} : vector<8x8x1xi32>
    %61 = vector.shape_cast %60 : vector<8x8x1xi32> to vector<64x1xi32>
    %cst_13 = arith.constant 0.000000e+00 : f32
    %62 = vector.broadcast %cst_13 : f32 to vector<9x32xf32>
    %63 = tpu.concatenate %62, %57, %62 in 0 : vector<9x32xf32>, vector<64x32xf32>, vector<9x32xf32> -> vector<82x32xf32>
    %64 = vector.extract_strided_slice %63 {offsets = [0, 0], sizes = [64, 32], strides = [1, 1]} : vector<82x32xf32> to vector<64x32xf32>
    %c-1_i32 = arith.constant -1 : i32
    %65 = vector.broadcast %c-1_i32 : i32 to vector<64x1xi32>
    %66 = arith.addi %59, %65 : vector<64x1xi32>
    %c-1_i32_14 = arith.constant -1 : i32
    %67 = vector.broadcast %c-1_i32_14 : i32 to vector<64x1xi32>
    %68 = arith.addi %61, %67 : vector<64x1xi32>
    %c0_i32_15 = arith.constant 0 : i32
    %69 = vector.broadcast %c0_i32_15 : i32 to vector<64x1xi32>
    %70 = arith.cmpi sge, %66, %69 : vector<64x1xi32>
    %c8_i32 = arith.constant 8 : i32
    %71 = vector.broadcast %c8_i32 : i32 to vector<64x1xi32>
    %72 = arith.cmpi slt, %66, %71 : vector<64x1xi32>
    %73 = arith.andi %70, %72 : vector<64x1xi1>
    %c0_i32_16 = arith.constant 0 : i32
    %74 = vector.broadcast %c0_i32_16 : i32 to vector<64x1xi32>
    %75 = arith.cmpi sge, %68, %74 : vector<64x1xi32>
    %76 = arith.andi %73, %75 : vector<64x1xi1>
    %c8_i32_17 = arith.constant 8 : i32
    %77 = vector.broadcast %c8_i32_17 : i32 to vector<64x1xi32>
    %78 = arith.cmpi slt, %68, %77 : vector<64x1xi32>
    %79 = arith.andi %76, %78 : vector<64x1xi1>
    %cst_18 = arith.constant 0.000000e+00 : f32
    %80 = vector.shape_cast %79 : vector<64x1xi1> to vector<64x1xi1>
    %81 = vector.broadcast %80 : vector<64x1xi1> to vector<64x32xi1>
    %82 = vector.broadcast %cst_18 : f32 to vector<64x32xf32>
    %83 = arith.select %81, %64, %82 : vector<64x32xi1>, vector<64x32xf32>
    %84 = vector.extract_strided_slice %63 {offsets = [1, 0], sizes = [64, 32], strides = [1, 1]} : vector<82x32xf32> to vector<64x32xf32>
    %c-1_i32_19 = arith.constant -1 : i32
    %85 = vector.broadcast %c-1_i32_19 : i32 to vector<64x1xi32>
    %86 = arith.addi %59, %85 : vector<64x1xi32>
    %c0_i32_20 = arith.constant 0 : i32
    %87 = vector.broadcast %c0_i32_20 : i32 to vector<64x1xi32>
    %88 = arith.addi %61, %87 : vector<64x1xi32>
    %c0_i32_21 = arith.constant 0 : i32
    %89 = vector.broadcast %c0_i32_21 : i32 to vector<64x1xi32>
    %90 = arith.cmpi sge, %86, %89 : vector<64x1xi32>
    %c8_i32_22 = arith.constant 8 : i32
    %91 = vector.broadcast %c8_i32_22 : i32 to vector<64x1xi32>
    %92 = arith.cmpi slt, %86, %91 : vector<64x1xi32>
    %93 = arith.andi %90, %92 : vector<64x1xi1>
    %c0_i32_23 = arith.constant 0 : i32
    %94 = vector.broadcast %c0_i32_23 : i32 to vector<64x1xi32>
    %95 = arith.cmpi sge, %88, %94 : vector<64x1xi32>
    %96 = arith.andi %93, %95 : vector<64x1xi1>
    %c8_i32_24 = arith.constant 8 : i32
    %97 = vector.broadcast %c8_i32_24 : i32 to vector<64x1xi32>
    %98 = arith.cmpi slt, %88, %97 : vector<64x1xi32>
    %99 = arith.andi %96, %98 : vector<64x1xi1>
    %cst_25 = arith.constant 0.000000e+00 : f32
    %100 = vector.shape_cast %99 : vector<64x1xi1> to vector<64x1xi1>
    %101 = vector.broadcast %100 : vector<64x1xi1> to vector<64x32xi1>
    %102 = vector.broadcast %cst_25 : f32 to vector<64x32xf32>
    %103 = arith.select %101, %84, %102 : vector<64x32xi1>, vector<64x32xf32>
    %104 = vector.extract_strided_slice %63 {offsets = [2, 0], sizes = [64, 32], strides = [1, 1]} : vector<82x32xf32> to vector<64x32xf32>
    %c-1_i32_26 = arith.constant -1 : i32
    %105 = vector.broadcast %c-1_i32_26 : i32 to vector<64x1xi32>
    %106 = arith.addi %59, %105 : vector<64x1xi32>
    %c1_i32 = arith.constant 1 : i32
    %107 = vector.broadcast %c1_i32 : i32 to vector<64x1xi32>
    %108 = arith.addi %61, %107 : vector<64x1xi32>
    %c0_i32_27 = arith.constant 0 : i32
    %109 = vector.broadcast %c0_i32_27 : i32 to vector<64x1xi32>
    %110 = arith.cmpi sge, %106, %109 : vector<64x1xi32>
    %c8_i32_28 = arith.constant 8 : i32
    %111 = vector.broadcast %c8_i32_28 : i32 to vector<64x1xi32>
    %112 = arith.cmpi slt, %106, %111 : vector<64x1xi32>
    %113 = arith.andi %110, %112 : vector<64x1xi1>
    %c0_i32_29 = arith.constant 0 : i32
    %114 = vector.broadcast %c0_i32_29 : i32 to vector<64x1xi32>
    %115 = arith.cmpi sge, %108, %114 : vector<64x1xi32>
    %116 = arith.andi %113, %115 : vector<64x1xi1>
    %c8_i32_30 = arith.constant 8 : i32
    %117 = vector.broadcast %c8_i32_30 : i32 to vector<64x1xi32>
    %118 = arith.cmpi slt, %108, %117 : vector<64x1xi32>
    %119 = arith.andi %116, %118 : vector<64x1xi1>
    %cst_31 = arith.constant 0.000000e+00 : f32
    %120 = vector.shape_cast %119 : vector<64x1xi1> to vector<64x1xi1>
    %121 = vector.broadcast %120 : vector<64x1xi1> to vector<64x32xi1>
    %122 = vector.broadcast %cst_31 : f32 to vector<64x32xf32>
    %123 = arith.select %121, %104, %122 : vector<64x32xi1>, vector<64x32xf32>
    %124 = vector.extract_strided_slice %63 {offsets = [8, 0], sizes = [64, 32], strides = [1, 1]} : vector<82x32xf32> to vector<64x32xf32>
    %c0_i32_32 = arith.constant 0 : i32
    %125 = vector.broadcast %c0_i32_32 : i32 to vector<64x1xi32>
    %126 = arith.addi %59, %125 : vector<64x1xi32>
    %c-1_i32_33 = arith.constant -1 : i32
    %127 = vector.broadcast %c-1_i32_33 : i32 to vector<64x1xi32>
    %128 = arith.addi %61, %127 : vector<64x1xi32>
    %c0_i32_34 = arith.constant 0 : i32
    %129 = vector.broadcast %c0_i32_34 : i32 to vector<64x1xi32>
    %130 = arith.cmpi sge, %126, %129 : vector<64x1xi32>
    %c8_i32_35 = arith.constant 8 : i32
    %131 = vector.broadcast %c8_i32_35 : i32 to vector<64x1xi32>
    %132 = arith.cmpi slt, %126, %131 : vector<64x1xi32>
    %133 = arith.andi %130, %132 : vector<64x1xi1>
    %c0_i32_36 = arith.constant 0 : i32
    %134 = vector.broadcast %c0_i32_36 : i32 to vector<64x1xi32>
    %135 = arith.cmpi sge, %128, %134 : vector<64x1xi32>
    %136 = arith.andi %133, %135 : vector<64x1xi1>
    %c8_i32_37 = arith.constant 8 : i32
    %137 = vector.broadcast %c8_i32_37 : i32 to vector<64x1xi32>
    %138 = arith.cmpi slt, %128, %137 : vector<64x1xi32>
    %139 = arith.andi %136, %138 : vector<64x1xi1>
    %cst_38 = arith.constant 0.000000e+00 : f32
    %140 = vector.shape_cast %139 : vector<64x1xi1> to vector<64x1xi1>
    %141 = vector.broadcast %140 : vector<64x1xi1> to vector<64x32xi1>
    %142 = vector.broadcast %cst_38 : f32 to vector<64x32xf32>
    %143 = arith.select %141, %124, %142 : vector<64x32xi1>, vector<64x32xf32>
    %144 = vector.extract_strided_slice %63 {offsets = [9, 0], sizes = [64, 32], strides = [1, 1]} : vector<82x32xf32> to vector<64x32xf32>
    %c0_i32_39 = arith.constant 0 : i32
    %145 = vector.broadcast %c0_i32_39 : i32 to vector<64x1xi32>
    %146 = arith.addi %59, %145 : vector<64x1xi32>
    %c0_i32_40 = arith.constant 0 : i32
    %147 = vector.broadcast %c0_i32_40 : i32 to vector<64x1xi32>
    %148 = arith.addi %61, %147 : vector<64x1xi32>
    %c0_i32_41 = arith.constant 0 : i32
    %149 = vector.broadcast %c0_i32_41 : i32 to vector<64x1xi32>
    %150 = arith.cmpi sge, %146, %149 : vector<64x1xi32>
    %c8_i32_42 = arith.constant 8 : i32
    %151 = vector.broadcast %c8_i32_42 : i32 to vector<64x1xi32>
    %152 = arith.cmpi slt, %146, %151 : vector<64x1xi32>
    %153 = arith.andi %150, %152 : vector<64x1xi1>
    %c0_i32_43 = arith.constant 0 : i32
    %154 = vector.broadcast %c0_i32_43 : i32 to vector<64x1xi32>
    %155 = arith.cmpi sge, %148, %154 : vector<64x1xi32>
    %156 = arith.andi %153, %155 : vector<64x1xi1>
    %c8_i32_44 = arith.constant 8 : i32
    %157 = vector.broadcast %c8_i32_44 : i32 to vector<64x1xi32>
    %158 = arith.cmpi slt, %148, %157 : vector<64x1xi32>
    %159 = arith.andi %156, %158 : vector<64x1xi1>
    %cst_45 = arith.constant 0.000000e+00 : f32
    %160 = vector.shape_cast %159 : vector<64x1xi1> to vector<64x1xi1>
    %161 = vector.broadcast %160 : vector<64x1xi1> to vector<64x32xi1>
    %162 = vector.broadcast %cst_45 : f32 to vector<64x32xf32>
    %163 = arith.select %161, %144, %162 : vector<64x32xi1>, vector<64x32xf32>
    %164 = vector.extract_strided_slice %63 {offsets = [10, 0], sizes = [64, 32], strides = [1, 1]} : vector<82x32xf32> to vector<64x32xf32>
    %c0_i32_46 = arith.constant 0 : i32
    %165 = vector.broadcast %c0_i32_46 : i32 to vector<64x1xi32>
    %166 = arith.addi %59, %165 : vector<64x1xi32>
    %c1_i32_47 = arith.constant 1 : i32
    %167 = vector.broadcast %c1_i32_47 : i32 to vector<64x1xi32>
    %168 = arith.addi %61, %167 : vector<64x1xi32>
    %c0_i32_48 = arith.constant 0 : i32
    %169 = vector.broadcast %c0_i32_48 : i32 to vector<64x1xi32>
    %170 = arith.cmpi sge, %166, %169 : vector<64x1xi32>
    %c8_i32_49 = arith.constant 8 : i32
    %171 = vector.broadcast %c8_i32_49 : i32 to vector<64x1xi32>
    %172 = arith.cmpi slt, %166, %171 : vector<64x1xi32>
    %173 = arith.andi %170, %172 : vector<64x1xi1>
    %c0_i32_50 = arith.constant 0 : i32
    %174 = vector.broadcast %c0_i32_50 : i32 to vector<64x1xi32>
    %175 = arith.cmpi sge, %168, %174 : vector<64x1xi32>
    %176 = arith.andi %173, %175 : vector<64x1xi1>
    %c8_i32_51 = arith.constant 8 : i32
    %177 = vector.broadcast %c8_i32_51 : i32 to vector<64x1xi32>
    %178 = arith.cmpi slt, %168, %177 : vector<64x1xi32>
    %179 = arith.andi %176, %178 : vector<64x1xi1>
    %cst_52 = arith.constant 0.000000e+00 : f32
    %180 = vector.shape_cast %179 : vector<64x1xi1> to vector<64x1xi1>
    %181 = vector.broadcast %180 : vector<64x1xi1> to vector<64x32xi1>
    %182 = vector.broadcast %cst_52 : f32 to vector<64x32xf32>
    %183 = arith.select %181, %164, %182 : vector<64x32xi1>, vector<64x32xf32>
    %184 = vector.extract_strided_slice %63 {offsets = [16, 0], sizes = [64, 32], strides = [1, 1]} : vector<82x32xf32> to vector<64x32xf32>
    %c1_i32_53 = arith.constant 1 : i32
    %185 = vector.broadcast %c1_i32_53 : i32 to vector<64x1xi32>
    %186 = arith.addi %59, %185 : vector<64x1xi32>
    %c-1_i32_54 = arith.constant -1 : i32
    %187 = vector.broadcast %c-1_i32_54 : i32 to vector<64x1xi32>
    %188 = arith.addi %61, %187 : vector<64x1xi32>
    %c0_i32_55 = arith.constant 0 : i32
    %189 = vector.broadcast %c0_i32_55 : i32 to vector<64x1xi32>
    %190 = arith.cmpi sge, %186, %189 : vector<64x1xi32>
    %c8_i32_56 = arith.constant 8 : i32
    %191 = vector.broadcast %c8_i32_56 : i32 to vector<64x1xi32>
    %192 = arith.cmpi slt, %186, %191 : vector<64x1xi32>
    %193 = arith.andi %190, %192 : vector<64x1xi1>
    %c0_i32_57 = arith.constant 0 : i32
    %194 = vector.broadcast %c0_i32_57 : i32 to vector<64x1xi32>
    %195 = arith.cmpi sge, %188, %194 : vector<64x1xi32>
    %196 = arith.andi %193, %195 : vector<64x1xi1>
    %c8_i32_58 = arith.constant 8 : i32
    %197 = vector.broadcast %c8_i32_58 : i32 to vector<64x1xi32>
    %198 = arith.cmpi slt, %188, %197 : vector<64x1xi32>
    %199 = arith.andi %196, %198 : vector<64x1xi1>
    %cst_59 = arith.constant 0.000000e+00 : f32
    %200 = vector.shape_cast %199 : vector<64x1xi1> to vector<64x1xi1>
    %201 = vector.broadcast %200 : vector<64x1xi1> to vector<64x32xi1>
    %202 = vector.broadcast %cst_59 : f32 to vector<64x32xf32>
    %203 = arith.select %201, %184, %202 : vector<64x32xi1>, vector<64x32xf32>
    %204 = vector.extract_strided_slice %63 {offsets = [17, 0], sizes = [64, 32], strides = [1, 1]} : vector<82x32xf32> to vector<64x32xf32>
    %c1_i32_60 = arith.constant 1 : i32
    %205 = vector.broadcast %c1_i32_60 : i32 to vector<64x1xi32>
    %206 = arith.addi %59, %205 : vector<64x1xi32>
    %c0_i32_61 = arith.constant 0 : i32
    %207 = vector.broadcast %c0_i32_61 : i32 to vector<64x1xi32>
    %208 = arith.addi %61, %207 : vector<64x1xi32>
    %c0_i32_62 = arith.constant 0 : i32
    %209 = vector.broadcast %c0_i32_62 : i32 to vector<64x1xi32>
    %210 = arith.cmpi sge, %206, %209 : vector<64x1xi32>
    %c8_i32_63 = arith.constant 8 : i32
    %211 = vector.broadcast %c8_i32_63 : i32 to vector<64x1xi32>
    %212 = arith.cmpi slt, %206, %211 : vector<64x1xi32>
    %213 = arith.andi %210, %212 : vector<64x1xi1>
    %c0_i32_64 = arith.constant 0 : i32
    %214 = vector.broadcast %c0_i32_64 : i32 to vector<64x1xi32>
    %215 = arith.cmpi sge, %208, %214 : vector<64x1xi32>
    %216 = arith.andi %213, %215 : vector<64x1xi1>
    %c8_i32_65 = arith.constant 8 : i32
    %217 = vector.broadcast %c8_i32_65 : i32 to vector<64x1xi32>
    %218 = arith.cmpi slt, %208, %217 : vector<64x1xi32>
    %219 = arith.andi %216, %218 : vector<64x1xi1>
    %cst_66 = arith.constant 0.000000e+00 : f32
    %220 = vector.shape_cast %219 : vector<64x1xi1> to vector<64x1xi1>
    %221 = vector.broadcast %220 : vector<64x1xi1> to vector<64x32xi1>
    %222 = vector.broadcast %cst_66 : f32 to vector<64x32xf32>
    %223 = arith.select %221, %204, %222 : vector<64x32xi1>, vector<64x32xf32>
    %224 = vector.extract_strided_slice %63 {offsets = [18, 0], sizes = [64, 32], strides = [1, 1]} : vector<82x32xf32> to vector<64x32xf32>
    %c1_i32_67 = arith.constant 1 : i32
    %225 = vector.broadcast %c1_i32_67 : i32 to vector<64x1xi32>
    %226 = arith.addi %59, %225 : vector<64x1xi32>
    %c1_i32_68 = arith.constant 1 : i32
    %227 = vector.broadcast %c1_i32_68 : i32 to vector<64x1xi32>
    %228 = arith.addi %61, %227 : vector<64x1xi32>
    %c0_i32_69 = arith.constant 0 : i32
    %229 = vector.broadcast %c0_i32_69 : i32 to vector<64x1xi32>
    %230 = arith.cmpi sge, %226, %229 : vector<64x1xi32>
    %c8_i32_70 = arith.constant 8 : i32
    %231 = vector.broadcast %c8_i32_70 : i32 to vector<64x1xi32>
    %232 = arith.cmpi slt, %226, %231 : vector<64x1xi32>
    %233 = arith.andi %230, %232 : vector<64x1xi1>
    %c0_i32_71 = arith.constant 0 : i32
    %234 = vector.broadcast %c0_i32_71 : i32 to vector<64x1xi32>
    %235 = arith.cmpi sge, %228, %234 : vector<64x1xi32>
    %236 = arith.andi %233, %235 : vector<64x1xi1>
    %c8_i32_72 = arith.constant 8 : i32
    %237 = vector.broadcast %c8_i32_72 : i32 to vector<64x1xi32>
    %238 = arith.cmpi slt, %228, %237 : vector<64x1xi32>
    %239 = arith.andi %236, %238 : vector<64x1xi1>
    %cst_73 = arith.constant 0.000000e+00 : f32
    %240 = vector.shape_cast %239 : vector<64x1xi1> to vector<64x1xi1>
    %241 = vector.broadcast %240 : vector<64x1xi1> to vector<64x32xi1>
    %242 = vector.broadcast %cst_73 : f32 to vector<64x32xf32>
    %243 = arith.select %241, %224, %242 : vector<64x32xi1>, vector<64x32xf32>
    %244 = tpu.concatenate %83, %103, %123, %143, %163, %183, %203, %223, %243 in 1 : vector<64x32xf32>, vector<64x32xf32>, vector<64x32xf32>, vector<64x32xf32>, vector<64x32xf32>, vector<64x32xf32>, vector<64x32xf32>, vector<64x32xf32>, vector<64x32xf32> -> vector<64x288xf32>
    %c0_74 = arith.constant 0 : index
    %c0_75 = arith.constant 0 : index
    %245 = vector.load %arg3[%c0_74, %c0_75] : memref<288x16xf32, #tpu.memory_space<vmem>>, vector<288x16xf32>
    %cst_76 = arith.constant dense<0.000000e+00> : vector<64x16xf32>
    %246 = tpu.matmul %244, %245, %cst_76 {dimension_numbers = #tpu.dot_dimension_numbers<[1], [0], [0], [1], [0, 0, 1, 1], [], []>} : vector<64x288xf32>, vector<288x16xf32>, vector<64x16xf32> -> vector<64x16xf32>
    %c0_77 = arith.constant 0 : index
    %c0_78 = arith.constant 0 : index
    %247 = vector.load %arg4[%c0_77, %c0_78] : memref<1x16xf32, #tpu.memory_space<vmem>>, vector<1x16xf32>
    %248 = vector.broadcast %247 : vector<1x16xf32> to vector<64x16xf32>
    %249 = arith.addf %246, %248 : vector<64x16xf32>
    %cst_79 = arith.constant 0.000000e+00 : f32
    %250 = vector.broadcast %cst_79 : f32 to vector<64x16xf32>
    %251 = arith.cmpf oge, %249, %250 : vector<64x16xf32>
    %cst_80 = arith.constant 0.00999999977 : f32
    %252 = vector.broadcast %cst_80 : f32 to vector<64x16xf32>
    %253 = arith.mulf %252, %249 : vector<64x16xf32>
    %254 = arith.select %251, %249, %253 : vector<64x16xi1>, vector<64x16xf32>
    %cst_81 = arith.constant 0.000000e+00 : f32
    %255 = vector.broadcast %cst_81 : f32 to vector<9x16xf32>
    %256 = tpu.concatenate %255, %254, %255 in 0 : vector<9x16xf32>, vector<64x16xf32>, vector<9x16xf32> -> vector<82x16xf32>
    %257 = vector.extract_strided_slice %256 {offsets = [0, 0], sizes = [64, 16], strides = [1, 1]} : vector<82x16xf32> to vector<64x16xf32>
    %c-1_i32_82 = arith.constant -1 : i32
    %258 = vector.broadcast %c-1_i32_82 : i32 to vector<64x1xi32>
    %259 = arith.addi %59, %258 : vector<64x1xi32>
    %c-1_i32_83 = arith.constant -1 : i32
    %260 = vector.broadcast %c-1_i32_83 : i32 to vector<64x1xi32>
    %261 = arith.addi %61, %260 : vector<64x1xi32>
    %c0_i32_84 = arith.constant 0 : i32
    %262 = vector.broadcast %c0_i32_84 : i32 to vector<64x1xi32>
    %263 = arith.cmpi sge, %259, %262 : vector<64x1xi32>
    %c8_i32_85 = arith.constant 8 : i32
    %264 = vector.broadcast %c8_i32_85 : i32 to vector<64x1xi32>
    %265 = arith.cmpi slt, %259, %264 : vector<64x1xi32>
    %266 = arith.andi %263, %265 : vector<64x1xi1>
    %c0_i32_86 = arith.constant 0 : i32
    %267 = vector.broadcast %c0_i32_86 : i32 to vector<64x1xi32>
    %268 = arith.cmpi sge, %261, %267 : vector<64x1xi32>
    %269 = arith.andi %266, %268 : vector<64x1xi1>
    %c8_i32_87 = arith.constant 8 : i32
    %270 = vector.broadcast %c8_i32_87 : i32 to vector<64x1xi32>
    %271 = arith.cmpi slt, %261, %270 : vector<64x1xi32>
    %272 = arith.andi %269, %271 : vector<64x1xi1>
    %cst_88 = arith.constant 0.000000e+00 : f32
    %273 = vector.shape_cast %272 : vector<64x1xi1> to vector<64x1xi1>
    %274 = vector.broadcast %273 : vector<64x1xi1> to vector<64x16xi1>
    %275 = vector.broadcast %cst_88 : f32 to vector<64x16xf32>
    %276 = arith.select %274, %257, %275 : vector<64x16xi1>, vector<64x16xf32>
    %277 = vector.extract_strided_slice %256 {offsets = [1, 0], sizes = [64, 16], strides = [1, 1]} : vector<82x16xf32> to vector<64x16xf32>
    %c-1_i32_89 = arith.constant -1 : i32
    %278 = vector.broadcast %c-1_i32_89 : i32 to vector<64x1xi32>
    %279 = arith.addi %59, %278 : vector<64x1xi32>
    %c0_i32_90 = arith.constant 0 : i32
    %280 = vector.broadcast %c0_i32_90 : i32 to vector<64x1xi32>
    %281 = arith.addi %61, %280 : vector<64x1xi32>
    %c0_i32_91 = arith.constant 0 : i32
    %282 = vector.broadcast %c0_i32_91 : i32 to vector<64x1xi32>
    %283 = arith.cmpi sge, %279, %282 : vector<64x1xi32>
    %c8_i32_92 = arith.constant 8 : i32
    %284 = vector.broadcast %c8_i32_92 : i32 to vector<64x1xi32>
    %285 = arith.cmpi slt, %279, %284 : vector<64x1xi32>
    %286 = arith.andi %283, %285 : vector<64x1xi1>
    %c0_i32_93 = arith.constant 0 : i32
    %287 = vector.broadcast %c0_i32_93 : i32 to vector<64x1xi32>
    %288 = arith.cmpi sge, %281, %287 : vector<64x1xi32>
    %289 = arith.andi %286, %288 : vector<64x1xi1>
    %c8_i32_94 = arith.constant 8 : i32
    %290 = vector.broadcast %c8_i32_94 : i32 to vector<64x1xi32>
    %291 = arith.cmpi slt, %281, %290 : vector<64x1xi32>
    %292 = arith.andi %289, %291 : vector<64x1xi1>
    %cst_95 = arith.constant 0.000000e+00 : f32
    %293 = vector.shape_cast %292 : vector<64x1xi1> to vector<64x1xi1>
    %294 = vector.broadcast %293 : vector<64x1xi1> to vector<64x16xi1>
    %295 = vector.broadcast %cst_95 : f32 to vector<64x16xf32>
    %296 = arith.select %294, %277, %295 : vector<64x16xi1>, vector<64x16xf32>
    %297 = vector.extract_strided_slice %256 {offsets = [2, 0], sizes = [64, 16], strides = [1, 1]} : vector<82x16xf32> to vector<64x16xf32>
    %c-1_i32_96 = arith.constant -1 : i32
    %298 = vector.broadcast %c-1_i32_96 : i32 to vector<64x1xi32>
    %299 = arith.addi %59, %298 : vector<64x1xi32>
    %c1_i32_97 = arith.constant 1 : i32
    %300 = vector.broadcast %c1_i32_97 : i32 to vector<64x1xi32>
    %301 = arith.addi %61, %300 : vector<64x1xi32>
    %c0_i32_98 = arith.constant 0 : i32
    %302 = vector.broadcast %c0_i32_98 : i32 to vector<64x1xi32>
    %303 = arith.cmpi sge, %299, %302 : vector<64x1xi32>
    %c8_i32_99 = arith.constant 8 : i32
    %304 = vector.broadcast %c8_i32_99 : i32 to vector<64x1xi32>
    %305 = arith.cmpi slt, %299, %304 : vector<64x1xi32>
    %306 = arith.andi %303, %305 : vector<64x1xi1>
    %c0_i32_100 = arith.constant 0 : i32
    %307 = vector.broadcast %c0_i32_100 : i32 to vector<64x1xi32>
    %308 = arith.cmpi sge, %301, %307 : vector<64x1xi32>
    %309 = arith.andi %306, %308 : vector<64x1xi1>
    %c8_i32_101 = arith.constant 8 : i32
    %310 = vector.broadcast %c8_i32_101 : i32 to vector<64x1xi32>
    %311 = arith.cmpi slt, %301, %310 : vector<64x1xi32>
    %312 = arith.andi %309, %311 : vector<64x1xi1>
    %cst_102 = arith.constant 0.000000e+00 : f32
    %313 = vector.shape_cast %312 : vector<64x1xi1> to vector<64x1xi1>
    %314 = vector.broadcast %313 : vector<64x1xi1> to vector<64x16xi1>
    %315 = vector.broadcast %cst_102 : f32 to vector<64x16xf32>
    %316 = arith.select %314, %297, %315 : vector<64x16xi1>, vector<64x16xf32>
    %317 = vector.extract_strided_slice %256 {offsets = [8, 0], sizes = [64, 16], strides = [1, 1]} : vector<82x16xf32> to vector<64x16xf32>
    %c0_i32_103 = arith.constant 0 : i32
    %318 = vector.broadcast %c0_i32_103 : i32 to vector<64x1xi32>
    %319 = arith.addi %59, %318 : vector<64x1xi32>
    %c-1_i32_104 = arith.constant -1 : i32
    %320 = vector.broadcast %c-1_i32_104 : i32 to vector<64x1xi32>
    %321 = arith.addi %61, %320 : vector<64x1xi32>
    %c0_i32_105 = arith.constant 0 : i32
    %322 = vector.broadcast %c0_i32_105 : i32 to vector<64x1xi32>
    %323 = arith.cmpi sge, %319, %322 : vector<64x1xi32>
    %c8_i32_106 = arith.constant 8 : i32
    %324 = vector.broadcast %c8_i32_106 : i32 to vector<64x1xi32>
    %325 = arith.cmpi slt, %319, %324 : vector<64x1xi32>
    %326 = arith.andi %323, %325 : vector<64x1xi1>
    %c0_i32_107 = arith.constant 0 : i32
    %327 = vector.broadcast %c0_i32_107 : i32 to vector<64x1xi32>
    %328 = arith.cmpi sge, %321, %327 : vector<64x1xi32>
    %329 = arith.andi %326, %328 : vector<64x1xi1>
    %c8_i32_108 = arith.constant 8 : i32
    %330 = vector.broadcast %c8_i32_108 : i32 to vector<64x1xi32>
    %331 = arith.cmpi slt, %321, %330 : vector<64x1xi32>
    %332 = arith.andi %329, %331 : vector<64x1xi1>
    %cst_109 = arith.constant 0.000000e+00 : f32
    %333 = vector.shape_cast %332 : vector<64x1xi1> to vector<64x1xi1>
    %334 = vector.broadcast %333 : vector<64x1xi1> to vector<64x16xi1>
    %335 = vector.broadcast %cst_109 : f32 to vector<64x16xf32>
    %336 = arith.select %334, %317, %335 : vector<64x16xi1>, vector<64x16xf32>
    %337 = vector.extract_strided_slice %256 {offsets = [9, 0], sizes = [64, 16], strides = [1, 1]} : vector<82x16xf32> to vector<64x16xf32>
    %c0_i32_110 = arith.constant 0 : i32
    %338 = vector.broadcast %c0_i32_110 : i32 to vector<64x1xi32>
    %339 = arith.addi %59, %338 : vector<64x1xi32>
    %c0_i32_111 = arith.constant 0 : i32
    %340 = vector.broadcast %c0_i32_111 : i32 to vector<64x1xi32>
    %341 = arith.addi %61, %340 : vector<64x1xi32>
    %c0_i32_112 = arith.constant 0 : i32
    %342 = vector.broadcast %c0_i32_112 : i32 to vector<64x1xi32>
    %343 = arith.cmpi sge, %339, %342 : vector<64x1xi32>
    %c8_i32_113 = arith.constant 8 : i32
    %344 = vector.broadcast %c8_i32_113 : i32 to vector<64x1xi32>
    %345 = arith.cmpi slt, %339, %344 : vector<64x1xi32>
    %346 = arith.andi %343, %345 : vector<64x1xi1>
    %c0_i32_114 = arith.constant 0 : i32
    %347 = vector.broadcast %c0_i32_114 : i32 to vector<64x1xi32>
    %348 = arith.cmpi sge, %341, %347 : vector<64x1xi32>
    %349 = arith.andi %346, %348 : vector<64x1xi1>
    %c8_i32_115 = arith.constant 8 : i32
    %350 = vector.broadcast %c8_i32_115 : i32 to vector<64x1xi32>
    %351 = arith.cmpi slt, %341, %350 : vector<64x1xi32>
    %352 = arith.andi %349, %351 : vector<64x1xi1>
    %cst_116 = arith.constant 0.000000e+00 : f32
    %353 = vector.shape_cast %352 : vector<64x1xi1> to vector<64x1xi1>
    %354 = vector.broadcast %353 : vector<64x1xi1> to vector<64x16xi1>
    %355 = vector.broadcast %cst_116 : f32 to vector<64x16xf32>
    %356 = arith.select %354, %337, %355 : vector<64x16xi1>, vector<64x16xf32>
    %357 = vector.extract_strided_slice %256 {offsets = [10, 0], sizes = [64, 16], strides = [1, 1]} : vector<82x16xf32> to vector<64x16xf32>
    %c0_i32_117 = arith.constant 0 : i32
    %358 = vector.broadcast %c0_i32_117 : i32 to vector<64x1xi32>
    %359 = arith.addi %59, %358 : vector<64x1xi32>
    %c1_i32_118 = arith.constant 1 : i32
    %360 = vector.broadcast %c1_i32_118 : i32 to vector<64x1xi32>
    %361 = arith.addi %61, %360 : vector<64x1xi32>
    %c0_i32_119 = arith.constant 0 : i32
    %362 = vector.broadcast %c0_i32_119 : i32 to vector<64x1xi32>
    %363 = arith.cmpi sge, %359, %362 : vector<64x1xi32>
    %c8_i32_120 = arith.constant 8 : i32
    %364 = vector.broadcast %c8_i32_120 : i32 to vector<64x1xi32>
    %365 = arith.cmpi slt, %359, %364 : vector<64x1xi32>
    %366 = arith.andi %363, %365 : vector<64x1xi1>
    %c0_i32_121 = arith.constant 0 : i32
    %367 = vector.broadcast %c0_i32_121 : i32 to vector<64x1xi32>
    %368 = arith.cmpi sge, %361, %367 : vector<64x1xi32>
    %369 = arith.andi %366, %368 : vector<64x1xi1>
    %c8_i32_122 = arith.constant 8 : i32
    %370 = vector.broadcast %c8_i32_122 : i32 to vector<64x1xi32>
    %371 = arith.cmpi slt, %361, %370 : vector<64x1xi32>
    %372 = arith.andi %369, %371 : vector<64x1xi1>
    %cst_123 = arith.constant 0.000000e+00 : f32
    %373 = vector.shape_cast %372 : vector<64x1xi1> to vector<64x1xi1>
    %374 = vector.broadcast %373 : vector<64x1xi1> to vector<64x16xi1>
    %375 = vector.broadcast %cst_123 : f32 to vector<64x16xf32>
    %376 = arith.select %374, %357, %375 : vector<64x16xi1>, vector<64x16xf32>
    %377 = vector.extract_strided_slice %256 {offsets = [16, 0], sizes = [64, 16], strides = [1, 1]} : vector<82x16xf32> to vector<64x16xf32>
    %c1_i32_124 = arith.constant 1 : i32
    %378 = vector.broadcast %c1_i32_124 : i32 to vector<64x1xi32>
    %379 = arith.addi %59, %378 : vector<64x1xi32>
    %c-1_i32_125 = arith.constant -1 : i32
    %380 = vector.broadcast %c-1_i32_125 : i32 to vector<64x1xi32>
    %381 = arith.addi %61, %380 : vector<64x1xi32>
    %c0_i32_126 = arith.constant 0 : i32
    %382 = vector.broadcast %c0_i32_126 : i32 to vector<64x1xi32>
    %383 = arith.cmpi sge, %379, %382 : vector<64x1xi32>
    %c8_i32_127 = arith.constant 8 : i32
    %384 = vector.broadcast %c8_i32_127 : i32 to vector<64x1xi32>
    %385 = arith.cmpi slt, %379, %384 : vector<64x1xi32>
    %386 = arith.andi %383, %385 : vector<64x1xi1>
    %c0_i32_128 = arith.constant 0 : i32
    %387 = vector.broadcast %c0_i32_128 : i32 to vector<64x1xi32>
    %388 = arith.cmpi sge, %381, %387 : vector<64x1xi32>
    %389 = arith.andi %386, %388 : vector<64x1xi1>
    %c8_i32_129 = arith.constant 8 : i32
    %390 = vector.broadcast %c8_i32_129 : i32 to vector<64x1xi32>
    %391 = arith.cmpi slt, %381, %390 : vector<64x1xi32>
    %392 = arith.andi %389, %391 : vector<64x1xi1>
    %cst_130 = arith.constant 0.000000e+00 : f32
    %393 = vector.shape_cast %392 : vector<64x1xi1> to vector<64x1xi1>
    %394 = vector.broadcast %393 : vector<64x1xi1> to vector<64x16xi1>
    %395 = vector.broadcast %cst_130 : f32 to vector<64x16xf32>
    %396 = arith.select %394, %377, %395 : vector<64x16xi1>, vector<64x16xf32>
    %397 = vector.extract_strided_slice %256 {offsets = [17, 0], sizes = [64, 16], strides = [1, 1]} : vector<82x16xf32> to vector<64x16xf32>
    %c1_i32_131 = arith.constant 1 : i32
    %398 = vector.broadcast %c1_i32_131 : i32 to vector<64x1xi32>
    %399 = arith.addi %59, %398 : vector<64x1xi32>
    %c0_i32_132 = arith.constant 0 : i32
    %400 = vector.broadcast %c0_i32_132 : i32 to vector<64x1xi32>
    %401 = arith.addi %61, %400 : vector<64x1xi32>
    %c0_i32_133 = arith.constant 0 : i32
    %402 = vector.broadcast %c0_i32_133 : i32 to vector<64x1xi32>
    %403 = arith.cmpi sge, %399, %402 : vector<64x1xi32>
    %c8_i32_134 = arith.constant 8 : i32
    %404 = vector.broadcast %c8_i32_134 : i32 to vector<64x1xi32>
    %405 = arith.cmpi slt, %399, %404 : vector<64x1xi32>
    %406 = arith.andi %403, %405 : vector<64x1xi1>
    %c0_i32_135 = arith.constant 0 : i32
    %407 = vector.broadcast %c0_i32_135 : i32 to vector<64x1xi32>
    %408 = arith.cmpi sge, %401, %407 : vector<64x1xi32>
    %409 = arith.andi %406, %408 : vector<64x1xi1>
    %c8_i32_136 = arith.constant 8 : i32
    %410 = vector.broadcast %c8_i32_136 : i32 to vector<64x1xi32>
    %411 = arith.cmpi slt, %401, %410 : vector<64x1xi32>
    %412 = arith.andi %409, %411 : vector<64x1xi1>
    %cst_137 = arith.constant 0.000000e+00 : f32
    %413 = vector.shape_cast %412 : vector<64x1xi1> to vector<64x1xi1>
    %414 = vector.broadcast %413 : vector<64x1xi1> to vector<64x16xi1>
    %415 = vector.broadcast %cst_137 : f32 to vector<64x16xf32>
    %416 = arith.select %414, %397, %415 : vector<64x16xi1>, vector<64x16xf32>
    %417 = vector.extract_strided_slice %256 {offsets = [18, 0], sizes = [64, 16], strides = [1, 1]} : vector<82x16xf32> to vector<64x16xf32>
    %c1_i32_138 = arith.constant 1 : i32
    %418 = vector.broadcast %c1_i32_138 : i32 to vector<64x1xi32>
    %419 = arith.addi %59, %418 : vector<64x1xi32>
    %c1_i32_139 = arith.constant 1 : i32
    %420 = vector.broadcast %c1_i32_139 : i32 to vector<64x1xi32>
    %421 = arith.addi %61, %420 : vector<64x1xi32>
    %c0_i32_140 = arith.constant 0 : i32
    %422 = vector.broadcast %c0_i32_140 : i32 to vector<64x1xi32>
    %423 = arith.cmpi sge, %419, %422 : vector<64x1xi32>
    %c8_i32_141 = arith.constant 8 : i32
    %424 = vector.broadcast %c8_i32_141 : i32 to vector<64x1xi32>
    %425 = arith.cmpi slt, %419, %424 : vector<64x1xi32>
    %426 = arith.andi %423, %425 : vector<64x1xi1>
    %c0_i32_142 = arith.constant 0 : i32
    %427 = vector.broadcast %c0_i32_142 : i32 to vector<64x1xi32>
    %428 = arith.cmpi sge, %421, %427 : vector<64x1xi32>
    %429 = arith.andi %426, %428 : vector<64x1xi1>
    %c8_i32_143 = arith.constant 8 : i32
    %430 = vector.broadcast %c8_i32_143 : i32 to vector<64x1xi32>
    %431 = arith.cmpi slt, %421, %430 : vector<64x1xi32>
    %432 = arith.andi %429, %431 : vector<64x1xi1>
    %cst_144 = arith.constant 0.000000e+00 : f32
    %433 = vector.shape_cast %432 : vector<64x1xi1> to vector<64x1xi1>
    %434 = vector.broadcast %433 : vector<64x1xi1> to vector<64x16xi1>
    %435 = vector.broadcast %cst_144 : f32 to vector<64x16xf32>
    %436 = arith.select %434, %417, %435 : vector<64x16xi1>, vector<64x16xf32>
    %437 = tpu.concatenate %276, %296, %316, %336, %356, %376, %396, %416, %436 in 1 : vector<64x16xf32>, vector<64x16xf32>, vector<64x16xf32>, vector<64x16xf32>, vector<64x16xf32>, vector<64x16xf32>, vector<64x16xf32>, vector<64x16xf32>, vector<64x16xf32> -> vector<64x144xf32>
    %c0_145 = arith.constant 0 : index
    %c0_146 = arith.constant 0 : index
    %438 = vector.load %arg5[%c0_145, %c0_146] : memref<144x8xf32, #tpu.memory_space<vmem>>, vector<144x8xf32>
    %cst_147 = arith.constant dense<0.000000e+00> : vector<64x8xf32>
    %439 = tpu.matmul %437, %438, %cst_147 {dimension_numbers = #tpu.dot_dimension_numbers<[1], [0], [0], [1], [0, 0, 1, 1], [], []>} : vector<64x144xf32>, vector<144x8xf32>, vector<64x8xf32> -> vector<64x8xf32>
    %c0_148 = arith.constant 0 : index
    %c0_149 = arith.constant 0 : index
    %440 = vector.load %arg6[%c0_148, %c0_149] : memref<1x8xf32, #tpu.memory_space<vmem>>, vector<1x8xf32>
    %441 = vector.broadcast %440 : vector<1x8xf32> to vector<64x8xf32>
    %442 = arith.addf %439, %441 : vector<64x8xf32>
    %cst_150 = arith.constant 0.000000e+00 : f32
    %443 = vector.broadcast %cst_150 : f32 to vector<64x8xf32>
    %444 = arith.cmpf oge, %442, %443 : vector<64x8xf32>
    %cst_151 = arith.constant 0.00999999977 : f32
    %445 = vector.broadcast %cst_151 : f32 to vector<64x8xf32>
    %446 = arith.mulf %445, %442 : vector<64x8xf32>
    %447 = arith.select %444, %442, %446 : vector<64x8xi1>, vector<64x8xf32>
    %c0_152 = arith.constant 0 : index
    %c0_153 = arith.constant 0 : index
    %c0_154 = arith.constant 0 : index
    %448 = vector.load %arg7[%c0_152, %c0_153, %c0_154] : memref<1x64x8xf32, #tpu.memory_space<vmem>>, vector<1x64x8xf32>
    %449 = vector.shape_cast %448 : vector<1x64x8xf32> to vector<64x8xf32>
    %450 = vector.shape_cast %447 : vector<64x8xf32> to vector<1x64x8xf32>
    tpu.vector_store %arg7[%c0_152, %c0_153, %c0_154], %450 {strides = array<i32>} : memref<1x64x8xf32, #tpu.memory_space<vmem>>, vector<1x64x8xf32>,
    return
  }
  func.func @transform_0(%arg0: i32) -> (i32, i32, i32, i32) {
    %c0_i32 = arith.constant 0 : i32
    %c0_i32_0 = arith.constant 0 : i32
    %c0_i32_1 = arith.constant 0 : i32
    %c0_i32_2 = arith.constant 0 : i32
    return %arg0, %c0_i32, %c0_i32_0, %c0_i32_1 : i32, i32, i32, i32
  }
  func.func @transform_1(%arg0: i32) -> (i32, i32, i32) {
    %c0_i32 = arith.constant 0 : i32
    %c0_i32_0 = arith.constant 0 : i32
    %c0_i32_1 = arith.constant 0 : i32
    return %arg0, %c0_i32, %c0_i32_0 : i32, i32, i32
  }
  func.func @transform_2(%arg0: i32) -> (i32, i32) {
    %c0_i32 = arith.constant 0 : i32
    %c0_i32_0 = arith.constant 0 : i32
    %c0_i32_1 = arith.constant 0 : i32
    return %c0_i32, %c0_i32_0 : i32, i32
  }
  func.func @transform_3(%arg0: i32) -> (i32, i32) {
    %c0_i32 = arith.constant 0 : i32
    %c0_i32_0 = arith.constant 0 : i32
    %c0_i32_1 = arith.constant 0 : i32
    return %c0_i32, %c0_i32_0 : i32, i32
  }
  func.func @transform_4(%arg0: i32) -> (i32, i32) {
    %c0_i32 = arith.constant 0 : i32
    %c0_i32_0 = arith.constant 0 : i32
    %c0_i32_1 = arith.constant 0 : i32
    return %c0_i32, %c0_i32_0 : i32, i32
  }
  func.func @transform_5(%arg0: i32) -> (i32, i32) {
    %c0_i32 = arith.constant 0 : i32
    %c0_i32_0 = arith.constant 0 : i32
    %c0_i32_1 = arith.constant 0 : i32
    return %c0_i32, %c0_i32_0 : i32, i32
  }
  func.func @transform_6(%arg0: i32) -> (i32, i32, i32) {
    %c0_i32 = arith.constant 0 : i32
    %c0_i32_0 = arith.constant 0 : i32
    %c0_i32_1 = arith.constant 0 : i32
    return %arg0, %c0_i32, %c0_i32_0 : i32, i32, i32
  }
}

</mosaic_0001>

<bundles_post_ra>
// kernel: tpu_custom_call.1
= control target key start
LH: loop header
LB: loop body
LE: loop exit
PB: predicated region body
PF: predicated region fallthrough
CT: control target
= control target key end

     0   :  { %s3025_s21 = smov 0   ;;  %s4154_s0 = inlined_call_operand.vmem [shape: f32[2,4,4,16], index: 0, kind: input, shape index: {}]   ;;  %s4155_s1 = inlined_call_operand.vmem [shape: f32[2,64,16], index: 1, kind: input, shape index: {}]   ;;  %s4156_s2 = inlined_call_operand.vmem [shape: f32[288,16], index: 2, kind: input, shape index: {}]   ;;  %s4157_s3 = inlined_call_operand.vmem [shape: f32[1,16], index: 3, kind: input, shape index: {}]   ;;  %s4158_s4 = inlined_call_operand.vmem [shape: f32[144,8], index: 4, kind: input, shape index: {}]   ;;  %s4159_s5 = inlined_call_operand.vmem [shape: f32[1,8], index: 5, kind: input, shape index: {}]   ;;  %s4160_s6 = inlined_call_operand.vmem [shape: f32[2,64,8], index: 6, kind: output, shape index: {}]  }
   0x1 LB: > { %s2502_s22 = sadd.s32 4294967295, %s2977_s21   ;;  %p2506_p0 = scmp.ge.s32.totalorder %s2977_s21, 1  ;;  %s2977_s21 = sphi %s3025_s21, %s16_s21  }
   0x2   : > { %p222_p1 = scmp.lt.s32.totalorder %s2977_s21, 3 }
   0x4   : > { %p223_p2 = pnand %p2506_p0, %p222_p1 }
   0x5   : > { %p257_p3 = scmp.lt.s32.totalorder (!%p223_p2), %s2502_s22, 1  ;;  %v1640_v0 = vld [vmem:[%s4156_s2 + $0x100] sm:$0xff] (!%p223_p2)  ;;  %v1641_v1 = vld [vmem:[%s4156_s2 + $0x108] sm:$0xff] (!%p223_p2)  ;;  %v1642_v2 = vld [vmem:[%s4156_s2 + $0x110] sm:$0xff] (!%p223_p2)  ;;  %s2979_s11 = smov (!%p223_p2), 16   ;;  %v292_v31 = vlaneseq (!%p223_p2)  ;;  %vm319_vm0 = vcmask (!%p223_p2), 1046528  }
   0x6   : > { %226 = sbr.rel (%p223_p2) target bundleno = 910 (0x38e), region = 44  ;;  %v2654_v3 = vpack.c.bf16 (!%p223_p2), %v1641_v1, %v1640_v0  ;;  %v1643_v4 = vld [vmem:[%s4156_s2 + $0x118] sm:$0xff] (!%p223_p2)  ;;  %vm306_vm1 = vcmask (!%p223_p2), 1040384   ;;  %v2980_v43 = vmov (!%p223_p2), 1966171168   ;;  %vm1254_vm4 = vcmask (!%p223_p2), 130048  }
   0x7   : > { %v2658_v5 = vpack.c.bf16 (!%p223_p2), %v1643_v4, %v1642_v2  ;;  %v3078_v35 = vshrl.u32 (!%p223_p2), %v292_v31, 7  ;;  %v423_v44 = vunpack.c.l.s4 (!%p223_p2), %v2980_v43  ;;  %v2981_v62 = vmov (!%p223_p2), 1983009808   ;;  %s2983_s16 = smov (!%p223_p2), 64   ;;  %s2984_s17 = smov (!%p223_p2), 96  }
   0x8   : > { %2655 = vmatprep.subr.bf16.mxu1 (!%p223_p2), %v2654_v3  ;;  %v1081_v63 = vunpack.c.l.s4 (!%p223_p2), %v2981_v62  ;;  %v1609_v62 = vld [vmem:[%s4156_s2 + $0x8] sm:$0xff] (!%p223_p2)  ;;  %vm1351_vm6 = vcmask (!%p223_p2), 1045504   ;;  %vm1557_vm8 = vcmask (!%p223_p2), 261120   ;;  %s2985_s14 = smov (!%p223_p2), 32   ;;  %vm1566_vm9 = vcmask (!%p223_p2), 523264   ;;  %s2987_s27 = smov (!%p223_p2), 48  }
   0x9   : > { %2657 = vmatpush3.bf16.msra.mxu1 (!%p223_p2), %v2654_v3  ;;  %vm354_vm2 = vcmp.eq.s32.totalorder (!%p223_p2), %v3078_v35, 3  ;;  %vm334_vm3 = vcmp.eq.s32.totalorder (!%p223_p2), %v3078_v35, 0  ;;  %v424_v52 = vunpack.c.0.s8 (!%p223_p2), %v423_v44  ;;  %vm1575_vm10 = vcmask (!%p223_p2), 785408   ;;  %s2988_s28 = smov (!%p223_p2), 80  }
   0xa   : > { %2659 = vmatprep.subr.bf16.mxu1 (!%p223_p2), %v2658_v5 }
   0xb   : > { %v3105_v59 = vsub.s32 (!%p223_p2), %v424_v52, %v3078_v35 }
   0xd   : > { %s4162_s22 = smov (!%p257_p3, %s2502_s22), 1  ;;  %2661 = vmatpush3.bf16.msra.mxu1 %v2658_v5 }
   0xe   : > { %s2532_s7 = sshll.u32 %s4162_s22, 6  ;;  %s2531_s12 = sshll.u32 %s4162_s22, 4 }
   0xf   : > { %s266_s10 = scalar_lea.vmem %s4155_s1, %s2532_s7  ;;  %s261_s15 = scalar_lea.vmem %s4154_s0, %s2531_s12 }
  0x10   : > { %v1040_v6 = vld [vmem:[%s266_s10 + $0x10] sm:$0xff]  ;;  %v1038_v7 = vld [vmem:[%s266_s10] sm:$0xff]  ;;  %v1041_v8 = vld [vmem:[%s266_s10 + $0x18] sm:$0xff]  ;;  %s4133_s12 = scalar_lea.vmem %s4160_s6, %s2532_s7 }
  0x11   : > { %1234 = vrot.lane.b32.xlu1 %v1040_v6, %s2979_s11  ;;  %1230 = vrot.lane.b32.xlu0 %v1038_v7, %s2979_s11  ;;  %v1039_v9 = vld [vmem:[%s266_s10 + $0x8] sm:$0xff]  ;;  %v1042_v11 = vld [vmem:[%s266_s10 + $0x20] sm:$0xff] }
  0x12   : > { %v1043_v10 = vld [vmem:[%s266_s10 + $0x28] sm:$0xff]  ;;  %v1045_v12 = vld [vmem:[%s266_s10 + $0x38] sm:$0xff]  ;;  %v1044_v13 = vld [vmem:[%s266_s10 + $0x30] sm:$0xff]  ;;  %s2989_s10 = smov 112  }
  0x13   : > { %v272_v14 = vld [vmem:[%s261_s15] sm:$0xf]  ;;  %v273_v15 = vld [vmem:[%s261_s15 + $0x4] sm:$0xf]  ;;  %v274_v16 = vld [vmem:[%s261_s15 + $0x8] sm:$0xf] }
  0x14   : > { %v275_v17 = vld [vmem:[%s261_s15 + $0xc] sm:$0xf]  ;;  %v276_v18 = vmul.f32 0.25, %v272_v14  ;;  %v277_v19 = vmul.f32 0.25, %v273_v15  ;;  %v278_v20 = vmul.f32 0.25, %v274_v16  ;;  %v279_v21 = vmul.f32 0.75, %v272_v14 }
  0x15   : > { %1236 = vrot.lane.b32.xlu1 %v1041_v8, %s2979_s11  ;;  %1232 = vrot.lane.b32.xlu0 %v1039_v9, %s2979_s11  ;;  %v280_v22 = vmul.f32 0.75, %v273_v15  ;;  %v281_v23 = vmul.f32 0.75, %v274_v16  ;;  %v287_v24 = vmul.f32 0.25, %v275_v17  ;;  %v282_v61 = vmul.f32 0.75, %v275_v17 }
  0x16   : > { %v283_v25 = vadd.f32 %v279_v21, %v276_v18  ;;  %v3065_v27 = vadd.f32 %v279_v21, %v277_v19  ;;  %v1082_v8 = vunpack.c.0.s8 %v1081_v63  ;;  %v3118_v15 = vsub.s32 0, %v3078_v35 }
  0x17   : > { %v284_v26 = vadd.f32 %v280_v22, %v276_v18  ;;  %v289_v28 = vadd.f32 %v280_v22, %v278_v20  ;;  %v3067_v29 = vadd.f32 %v281_v23, %v277_v19  ;;  %v3069_v30 = vadd.f32 %v287_v24, %v281_v23 }
  0x18   : > { %v302_v32 = vcombine.low %v283_v25, %v3065_v27  ;;  %v382_v54 = vmul.f32 0.75, %v283_v25  ;;  %v3109_v5 = vadd.f32 %v282_v61, %v278_v20  ;;  %v3111_v6 = vadd.f32 %v287_v24, %v282_v61  ;;  %v1608_v61 = vld [vmem:[%s4156_s2] sm:$0xff] }
  0x19   : > { %1240 = vrot.lane.b32.xlu1 %v1043_v10, %s2979_s11  ;;  %1238 = vrot.lane.b32.xlu0 %v1042_v11, %s2979_s11  ;;  %v3072_v33 = vcombine.low %v284_v26, %v289_v28  ;;  %v3076_v34 = vcombine.low %v3067_v29, %v3069_v30  ;;  %v384_v50 = vmul.f32 0.75, %v284_v26  ;;  %v3127_v19 = vsub.s32 %v1082_v8, %v3078_v35 }
  0x1a   : > { %v320_v37 = vrot.slane %v302_v32, 1  ;;  %v307_v39 = vrot.slane %v302_v32, 7  ;;  %v3124_v18 = vcombine.low %v3109_v5, %v3111_v6  ;;  %v385_v22 = vmul.f32 0.75, %v289_v28 }
  0x1b   : > { %v321_v36 = vrot.slane %v3072_v33, 1  ;;  %v323_v38 = vrot.slane %v3076_v34, 1  ;;  %v308_v40 = vrot.slane %v3072_v33, 7 }
  0x1c   : > { %v318_v46 = vsel %vm306_vm1, %v283_v25, %v307_v39  ;;  %v325_v43 = vrot.slane %v3124_v18, 1 }
  0x1d   : > { %1244 = vrot.lane.b32.xlu1 %v1045_v12, %s2979_s11  ;;  %1242 = vrot.lane.b32.xlu0 %v1044_v13, %s2979_s11  ;;  %v3085_v41 = vsel %vm319_vm0, %v320_v37, %v321_v36  ;;  %v324_v42 = vsel %vm319_vm0, %v321_v36, %v323_v38  ;;  %v309_v48 = vsel %vm306_vm1, %v307_v39, %v308_v40 }
  0x1e   : > { %v368_v45 = vsel %vm354_vm2, %v284_v26, %v324_v42  ;;  %v366_v47 = vsel %vm354_vm2, %v283_v25, %v3085_v41  ;;  %v348_v49 = vsel %vm334_vm3, %v284_v26, %v309_v48  ;;  %v346_v53 = vsel %vm334_vm3, %v283_v25, %v318_v46 }
  0x1f   : > { %v400_v51 = vmul.f32 0.25, %v368_v45  ;;  %v398_v55 = vmul.f32 0.25, %v366_v47  ;;  %v376_v56 = vmul.f32 0.25, %v348_v49  ;;  %v374_v58 = vmul.f32 0.25, %v346_v53 }
  0x20   : > { %v339_v0 = vcombine.high %v309_v48, %v309_v48  ;;  %v359_v7 = vcombine.high %v324_v42, %v324_v42  ;;  %v338_v13 = vcombine.high %v318_v46, %v318_v46  ;;  %v358_v24 = vcombine.high %v3085_v41, %v3085_v41 }
  0x21   : > { %v408_v57 = vadd.f32 %v400_v51, %v384_v50  ;;  %v406_v60 = vadd.f32 %v398_v55, %v382_v54  ;;  %v392_v1 = vadd.f32 %v384_v50, %v376_v56  ;;  %v390_v3 = vadd.f32 %v382_v54, %v374_v58  ;;  %v1624_v55 = vld [vmem:[%s4156_s2 + $0x80] sm:$0xff]  ;;  %v1625_v56 = vld [vmem:[%s4156_s2 + $0x88] sm:$0xff] }
  0x22   : > { %v349_v10 = vsel %vm334_vm3, %v289_v28, %v339_v0  ;;  %v369_v16 = vsel %vm354_vm2, %v289_v28, %v359_v7  ;;  %v383_v26 = vmul.f32 0.75, %v3065_v27  ;;  %v347_v37 = vsel %vm334_vm3, %v3065_v27, %v338_v13 }
  0x23   : > { %v708_v2 = vrot.slane %v408_v57, %v3105_v59  ;;  %v660_v4 = vrot.slane %v406_v60, %v3105_v59  ;;  %v476_v9 = vrot.slane %v392_v1, %v3105_v59  ;;  %v428_v12 = vrot.slane %v390_v3, %v3105_v59  ;;  %v1626_v3 = vld [vmem:[%s4156_s2 + $0x90] sm:$0xff] }
  0x24   : > { %v377_v17 = vmul.f32 0.25, %v349_v10  ;;  %v401_v36 = vmul.f32 0.25, %v369_v16  ;;  %v310_v42 = vrot.slane %v3076_v34, 7  ;;  %v367_v49 = vsel %vm354_vm2, %v3065_v27, %v358_v24 }
  0x25   : > { %v709_v11 = vcombine.high %v708_v2, %v708_v2  ;;  %v661_v14 = vcombine.high %v660_v4, %v660_v4  ;;  %v477_v20 = vcombine.high %v476_v9, %v476_v9  ;;  %v716_v21 = vrot.slane %v708_v2, %v3105_v59 }
  0x26   : > { %v429_v25 = vcombine.high %v428_v12, %v428_v12  ;;  %v668_v31 = vrot.slane %v660_v4, %v3105_v59  ;;  %v484_v39 = vrot.slane %v476_v9, %v3105_v59  ;;  %v393_v28 = vadd.f32 %v385_v22, %v377_v17  ;;  %v1627_v4 = vld [vmem:[%s4156_s2 + $0x98] sm:$0xff] }
  0x27   : > { %v723_v23 = vrot.slane %v709_v11, %v3105_v59  ;;  %v675_v32 = vrot.slane %v661_v14, %v3105_v59  ;;  %v491_v41 = vrot.slane %v477_v20, %v3105_v59  ;;  %v724_v44 = vcombine.high %v716_v21, %v716_v21  ;;  %v1610_v11 = vld [vmem:[%s4156_s2 + $0x10] sm:$0xff]  ;;  %v1628_v20 = vld [vmem:[%s4156_s2 + $0xa0] sm:$0xff] }
  0x28   : > { %v881_v45 = vrot.slane %v716_v21, %v3118_v15  ;;  %v436_v46 = vrot.slane %v428_v12, %v3105_v59  ;;  %v443_v48 = vrot.slane %v429_v25, %v3105_v59  ;;  %v375_v50 = vmul.f32 0.25, %v347_v37  ;;  %v1611_v12 = vld [vmem:[%s4156_s2 + $0x18] sm:$0xff]  ;;  %v1629_v21 = vld [vmem:[%s4156_s2 + $0xa8] sm:$0xff] }
  0x29   : > { %v725_v47 = vcombine.high %v723_v23, %v723_v23  ;;  %v885_v51 = vrot.slane %v723_v23, %v3118_v15  ;;  %v676_v52 = vcombine.high %v668_v31, %v668_v31  ;;  %v677_v53 = vcombine.high %v675_v32, %v675_v32 }
  0x2a   : > { %v409_v54 = vadd.f32 %v401_v36, %v385_v22  ;;  %v492_v57 = vcombine.high %v484_v39, %v484_v39  ;;  %v849_v58 = vrot.slane %v668_v31, %v3118_v15  ;;  %v853_v60 = vrot.slane %v675_v32, %v3118_v15 }
  0x2b   : > { %v3159_v27 = vrot.slane %v393_v28, %v3105_v59  ;;  %v493_v63 = vcombine.high %v491_v41, %v491_v41  ;;  %v889_v0 = vrot.slane %v724_v44, %v3118_v15  ;;  %v1014_v1 = vsel %vm306_vm1, %v484_v39, %v881_v45  ;;  %v1612_v45 = vld [vmem:[%s4156_s2 + $0x20] sm:$0xff] }
  0x2c   : > { %v444_v2 = vcombine.high %v436_v46, %v436_v46  ;;  %v893_v7 = vrot.slane %v725_v47, %v3118_v15  ;;  %v445_v8 = vcombine.high %v443_v48, %v443_v48  ;;  %v399_v9 = vmul.f32 0.25, %v367_v49 }
  0x2d   : > { %v2622_v10 = vpack.c.bf16 %v1625_v56, %v1624_v55  ;;  %v1015_v13 = vsel %vm306_vm1, %v491_v41, %v885_v51  ;;  %v857_v14 = vrot.slane %v676_v52, %v3118_v15  ;;  %v861_v16 = vrot.slane %v677_v53, %v3118_v15 }
  0x2e   : > { %v2624_v17 = vpack.c.bf16 %v1609_v62, %v1608_v61  ;;  %v1006_v22 = vsel %vm306_vm1, %v436_v46, %v849_v58  ;;  %v1007_v23 = vsel %vm306_vm1, %v443_v48, %v853_v60  ;;  %v732_v24 = vrot.slane %v409_v54, %v3105_v59 }
  0x2f   : > { %2623 = vmatprep.subr.bf16.mxu0 %v2622_v10  ;;  %v2626_v25 = vpack.c.bf16 %v1627_v4, %v1626_v3  ;;  %v1016_v31 = vsel %vm306_vm1, %v492_v57, %v889_v0  ;;  %v391_v32 = vadd.f32 %v383_v26, %v375_v50  ;;  %v326_v36 = vsel %vm319_vm0, %v323_v38, %v325_v43  ;;  %v1613_v38 = vld [vmem:[%s4156_s2 + $0x28] sm:$0xff] }
  0x30   : > { %2625 = vmatpush3.bf16.msra.mxu0 %v2624_v17  ;;  %v2628_v37 = vpack.c.bf16 %v1611_v12, %v1610_v11  ;;  %v1017_v39 = vsel %vm306_vm1, %v493_v63, %v893_v7  ;;  %v407_v28 = vadd.f32 %v399_v9, %v383_v26  ;;  %v311_v41 = vsel %vm306_vm1, %v308_v40, %v310_v42 }
  0x31   : > { %2627 = vmatprep.subr.bf16.mxu0 %v2626_v25  ;;  %v2630_v44 = vpack.c.bf16 %v1629_v21, %v1628_v20  ;;  %v1112_v46 = vcombine.low %v1014_v1, %v1015_v13  ;;  %v1008_v47 = vsel %vm306_vm1, %v444_v2, %v857_v14  ;;  %v1078_v26 = vcombine.low %v1006_v22, %v1007_v23 }
  0x32   : > { %v331_v48 = vrot.slane %v3111_v6, 4  ;;  %v1009_v33 = vsel %vm306_vm1, %v445_v8, %v861_v16  ;;  %v501_v40 = vcombine.high %v3159_v27, %v3159_v27  ;;  %v733_v49 = vcombine.high %v732_v24, %v732_v24 }
  0x33   : > { %v360_v50 = vcombine.high %v326_v36, %v326_v36  ;;  %v1113_v51 = vcombine.low %v1016_v31, %v1017_v39  ;;  %v452_v52 = vrot.slane %v391_v32, %v3105_v59  ;;  %v340_v53 = vcombine.high %v311_v41, %v311_v41 }
  0x34   : > { %2629 = vmatpush3.bf16.msra.mxu0 %v2628_v37  ;;  %v2632_v54 = vpack.c.bf16 %v1613_v38, %v1612_v45  ;;  %v684_v55 = vrot.slane %v407_v28, %v3105_v59  ;;  %v387_v56 = vmul.f32 0.75, %v3069_v30  ;;  %v3221_v57 = vmul.f32 0.75, %v3067_v29 }
  0x35   : > { %v312_v58 = vrot.slane %v3124_v18, 7  ;;  %2631 = vmatprep.subr.bf16.mxu0 %v2630_v44  ;;  %v1079_v60 = vcombine.low %v1008_v47, %v1009_v33  ;;  %v508_v61 = vrot.slane %v3159_v27, %v3105_v59  ;;  %v740_v62 = vrot.slane %v732_v24, %v3105_v59 }
  0x36   : > { %v333_v63 = vsel %vm319_vm0, %v325_v43, %v331_v48  ;;  %v3231_v0 = vrot.slane %v1112_v46, %v3127_v19  ;;  %v3234_v1 = vrot.slane %v1078_v26, %v3127_v19  ;;  %v747_v2 = vrot.slane %v733_v49, %v3105_v59 }
  0x37   : > { %v371_v3 = vsel %vm354_vm2, %v3069_v30, %v360_v50  ;;  %v3241_v27 = vrot.slane %v1113_v51, %v3127_v19  ;;  %v515_v4 = vrot.slane %v501_v40, %v3105_v59  ;;  %v453_v18 = vcombine.high %v452_v52, %v452_v52 }
  0x38   : > { %v351_v43 = vsel %vm334_vm3, %v3069_v30, %v340_v53  ;;  %2633 = vmatpush3.bf16.msra.mxu0 %v2632_v54  ;;  %v3248_v7 = vrot.slane %v452_v52, %v3105_v59  ;;  %v685_v8 = vcombine.high %v684_v55, %v684_v55  ;;  %v313_v9 = vsel %vm306_vm1, %v310_v42, %v312_v58 }
  0x39   : > { %v361_v10 = vcombine.high %v333_v63, %v333_v63  ;;  %v3254_v11 = vrot.slane %v1079_v60, %v3127_v19  ;;  %v516_v12 = vcombine.high %v508_v61, %v508_v61  ;;  %v748_v13 = vcombine.high %v740_v62, %v740_v62 }
  0x3a   : > { %v403_v14 = vmul.f32 0.25, %v371_v3  ;;  %v749_v16 = vcombine.high %v747_v2, %v747_v2  ;;  %v897_v17 = vrot.slane %v740_v62, %v3118_v15  ;;  %v379_v30 = vmul.f32 0.25, %v351_v43 }
  0x3b   : > { %v370_v20 = vsel %vm354_vm2, %v3067_v29, %v326_v36  ;;  %v517_v21 = vcombine.high %v515_v4, %v515_v4  ;;  %v901_v34 = vrot.slane %v747_v2, %v3118_v15  ;;  %v467_v42 = vrot.slane %v453_v18, %v3105_v59 }
  0x3c   : > { %v341_v22 = vcombine.high %v313_v9, %v313_v9  ;;  %v468_v23 = vcombine.high %v3248_v7, %v3248_v7  ;;  %v692_v24 = vrot.slane %v684_v55, %v3105_v59  ;;  %v699_v25 = vrot.slane %v685_v8, %v3105_v59 }
  0x3d   : > { %v373_v31 = vsel %vm354_vm2, %v3111_v6, %v361_v10  ;;  %v411_v32 = vadd.f32 %v403_v14, %v387_v56  ;;  %v350_v36 = vsel %vm334_vm3, %v3067_v29, %v311_v41  ;;  %v402_v37 = vmul.f32 0.25, %v370_v20 }
  0x3e   : > { %v372_v39 = vsel %vm354_vm2, %v3109_v5, %v333_v63  ;;  %v905_v28 = vrot.slane %v748_v13, %v3118_v15  ;;  %v909_v44 = vrot.slane %v749_v16, %v3118_v15  ;;  %v1018_v45 = vsel %vm306_vm1, %v508_v61, %v897_v17 }
  0x3f   : > { %v395_v38 = vadd.f32 %v387_v56, %v379_v30  ;;  %v1019_v46 = vsel %vm306_vm1, %v515_v4, %v901_v34  ;;  %v353_v47 = vsel %vm334_vm3, %v3111_v6, %v341_v22  ;;  %v389_v29 = vmul.f32 0.75, %v3111_v6 }
  0x40   : > { %v405_v41 = vmul.f32 0.25, %v373_v31  ;;  %v378_v26 = vmul.f32 0.25, %v350_v36  ;;  %v352_v48 = vsel %vm334_vm3, %v3109_v5, %v313_v9  ;;  %v388_v33 = vmul.f32 0.75, %v3109_v5 }
  0x41   : > { %v404_v40 = vmul.f32 0.25, %v372_v39  ;;  %v700_v49 = vcombine.high %v692_v24, %v692_v24  ;;  %v701_v50 = vcombine.high %v699_v25, %v699_v25  ;;  %v780_v51 = vrot.slane %v411_v32, %v3105_v59 }
  0x42   : > { %v410_v52 = vadd.f32 %v402_v37, %v3221_v57  ;;  %v1020_v53 = vsel %vm306_vm1, %v516_v12, %v905_v28  ;;  %v469_v54 = vcombine.high %v467_v42, %v467_v42  ;;  %v548_v6 = vrot.slane %v395_v38, %v3105_v59 }
  0x43   : > { %v381_v55 = vmul.f32 0.25, %v353_v47  ;;  %v1021_v56 = vsel %vm306_vm1, %v517_v21, %v909_v44  ;;  %v1129_v58 = vcombine.low %v1018_v45, %v1019_v46  ;;  %v413_v60 = vadd.f32 %v405_v41, %v389_v29 }
  0x44   : > { %v380_v61 = vmul.f32 0.25, %v352_v48  ;;  %v865_v5 = vrot.slane %v692_v24, %v3118_v15  ;;  %v869_v62 = vrot.slane %v699_v25, %v3118_v15  ;;  %v394_v63 = vadd.f32 %v3221_v57, %v378_v26 }
  0x45   : > { %v412_v2 = vadd.f32 %v404_v40, %v388_v33  ;;  %v873_v3 = vrot.slane %v700_v49, %v3118_v15  ;;  %v877_v4 = vrot.slane %v701_v50, %v3118_v15  ;;  %v781_v18 = vcombine.high %v780_v51, %v780_v51 }
  0x46   : > { %v756_v43 = vrot.slane %v410_v52, %v3105_v59  ;;  %v1128_v8 = vcombine.low %v3231_v0, %v3241_v27  ;;  %v1130_v9 = vcombine.low %v1020_v53, %v1021_v56  ;;  %v549_v10 = vcombine.high %v548_v6, %v548_v6  ;;  %v1614_v0 = vld [vmem:[%s4156_s2 + $0x30] sm:$0xff] }
  0x47   : > { %v397_v12 = vadd.f32 %v389_v29, %v381_v55  ;;  %v3301_v13 = vrot.slane %v1129_v58, %v3127_v19  ;;  %v788_v14 = vrot.slane %v780_v51, %v3105_v59  ;;  %v828_v57 = vrot.slane %v413_v60, %v3105_v59 }
  0x48   : > { %v396_v16 = vadd.f32 %v388_v33, %v380_v61  ;;  %v3307_v17 = vsel %vm306_vm1, %v3248_v7, %v865_v5  ;;  %v3310_v30 = vsel %vm306_vm1, %v467_v42, %v869_v62  ;;  %v524_v20 = vrot.slane %v394_v63, %v3105_v59 }
  0x49   : > { %v804_v21 = vrot.slane %v412_v2, %v3105_v59  ;;  %v3315_v34 = vsel %vm306_vm1, %v468_v23, %v873_v3  ;;  %v3318_v22 = vsel %vm306_vm1, %v469_v54, %v877_v4  ;;  %v795_v24 = vrot.slane %v781_v18, %v3105_v59 }
  0x4a   : > { %v757_v25 = vcombine.high %v756_v43, %v756_v43  ;;  %v3322_v31 = vrot.slane %v1130_v9, %v3127_v19  ;;  %v556_v7 = vrot.slane %v548_v6, %v3105_v59  ;;  %v563_v42 = vrot.slane %v549_v10, %v3105_v59 }
  0x4b   : > { %v596_v32 = vrot.slane %v397_v12, %v3105_v59  ;;  %v1095_v36 = vcombine.low %v3307_v17, %v3310_v30  ;;  %v796_v23 = vcombine.high %v788_v14, %v788_v14  ;;  %v829_v37 = vcombine.high %v828_v57, %v828_v57 }
  0x4c   : > { %v572_v39 = vrot.slane %v396_v16, %v3105_v59  ;;  %v1096_v28 = vcombine.low %v3315_v34, %v3318_v22  ;;  %v929_v44 = vrot.slane %v788_v14, %v3118_v15  ;;  %v525_v45 = vcombine.high %v524_v20, %v524_v20 }
  0x4d   : > { %v805_v38 = vcombine.high %v804_v21, %v804_v21  ;;  %v797_v46 = vcombine.high %v795_v24, %v795_v24  ;;  %v532_v47 = vrot.slane %v524_v20, %v3105_v59  ;;  %v764_v29 = vrot.slane %v756_v43, %v3105_v59 }
  0x4e   : > { %v771_v41 = vrot.slane %v757_v25, %v3105_v59  ;;  %v564_v26 = vcombine.high %v556_v7, %v556_v7  ;;  %v565_v48 = vcombine.high %v563_v42, %v563_v42  ;;  %v933_v33 = vrot.slane %v795_v24, %v3118_v15 }
  0x4f   : > { %v597_v40 = vcombine.high %v596_v32, %v596_v32  ;;  %v937_v49 = vrot.slane %v796_v23, %v3118_v15  ;;  %v836_v50 = vrot.slane %v828_v57, %v3105_v59  ;;  %v843_v51 = vrot.slane %v829_v37, %v3105_v59 }
  0x50   : > { %v573_v52 = vcombine.high %v572_v39, %v572_v39  ;;  %v3341_v53 = vsel %vm306_vm1, %v556_v7, %v929_v44  ;;  %v539_v54 = vrot.slane %v525_v45, %v3105_v59  ;;  %v812_v6 = vrot.slane %v804_v21, %v3105_v59 }
  0x51   : > { %v819_v55 = vrot.slane %v805_v38, %v3105_v59  ;;  %v941_v56 = vrot.slane %v797_v46, %v3118_v15  ;;  %v540_v58 = vcombine.high %v532_v47, %v532_v47  ;;  %v772_v60 = vcombine.high %v764_v29, %v764_v29 }
  0x52   : > { %v773_v61 = vcombine.high %v771_v41, %v771_v41  ;;  %v1027_v5 = vsel %vm306_vm1, %v563_v42, %v933_v33  ;;  %v604_v62 = vrot.slane %v596_v32, %v3105_v59  ;;  %v611_v63 = vrot.slane %v597_v40, %v3105_v59 }
  0x53   : > { %v580_v2 = vrot.slane %v572_v39, %v3105_v59  ;;  %v1028_v3 = vsel %vm306_vm1, %v564_v26, %v937_v49  ;;  %v844_v4 = vcombine.high %v836_v50, %v836_v50  ;;  %v845_v18 = vcombine.high %v843_v51, %v843_v51 }
  0x54   : > { %v587_v43 = vrot.slane %v573_v52, %v3105_v59  ;;  %v541_v9 = vcombine.high %v539_v54, %v539_v54  ;;  %v913_v10 = vrot.slane %v764_v29, %v3118_v15  ;;  %v820_v12 = vcombine.high %v812_v6, %v812_v6 }
  0x55   : > { %v821_v14 = vcombine.high %v819_v55, %v819_v55  ;;  %v1029_v57 = vsel %vm306_vm1, %v565_v48, %v941_v56  ;;  %v917_v16 = vrot.slane %v771_v41, %v3118_v15  ;;  %v921_v17 = vrot.slane %v772_v60, %v3118_v15 }
  0x56   : > { %v925_v30 = vrot.slane %v773_v61, %v3118_v15  ;;  %v612_v20 = vcombine.high %v604_v62, %v604_v62  ;;  %v613_v21 = vcombine.high %v611_v63, %v611_v63  ;;  %v961_v34 = vrot.slane %v836_v50, %v3118_v15 }
  0x57   : > { %v588_v22 = vcombine.high %v580_v2, %v580_v2  ;;  %v965_v59 = vrot.slane %v843_v51, %v3118_v15  ;;  %v969_v24 = vrot.slane %v844_v4, %v3118_v15  ;;  %v973_v25 = vrot.slane %v845_v18, %v3118_v15 }
  0x58   : > { %v589_v7 = vcombine.high %v587_v43, %v587_v43  ;;  %v945_v42 = vrot.slane %v812_v6, %v3118_v15  ;;  %v949_v32 = vrot.slane %v819_v55, %v3118_v15  ;;  %v953_v23 = vrot.slane %v820_v12, %v3118_v15 }
  0x59   : > { %v957_v37 = vrot.slane %v821_v14, %v3118_v15  ;;  %v1103_v39 = vrot.slane %v1095_v36, %v3127_v19  ;;  %v1110_v44 = vrot.slane %v1096_v28, %v3127_v19  ;;  %v1163_v45 = vcombine.low %v3341_v53, %v1027_v5 }
  0x5a   : > { %v1022_v38 = vsel %vm306_vm1, %v532_v47, %v913_v10  ;;  %v1164_v46 = vcombine.low %v1028_v3, %v1029_v57  ;;  %v1023_v29 = vsel %vm306_vm1, %v539_v54, %v917_v16  ;;  %v1024_v41 = vsel %vm306_vm1, %v540_v58, %v921_v17  ;;  %v1615_v3 = vld [vmem:[%s4156_s2 + $0x38] sm:$0xff] }
  0x5b   : > { %v1025_v26 = vsel %vm306_vm1, %v541_v9, %v925_v30  ;;  %v1034_v48 = vsel %vm306_vm1, %v604_v62, %v961_v34  ;;  %v1035_v33 = vsel %vm306_vm1, %v611_v63, %v965_v59  ;;  %v1036_v15 = vsel %vm306_vm1, %v612_v20, %v969_v24  ;;  %v1630_v63 = vld [vmem:[%s4156_s2 + $0xb0] sm:$0xff] }
  0x5c   : > { %v1037_v36 = vsel %vm306_vm1, %v613_v21, %v973_v25  ;;  %v1030_v28 = vsel %vm306_vm1, %v580_v2, %v945_v42  ;;  %v1031_v40 = vsel %vm306_vm1, %v587_v43, %v949_v32  ;;  %v1032_v47 = vsel %vm306_vm1, %v588_v22, %v953_v23  ;;  %v1633_v21 = vld [vmem:[%s4156_s2 + $0xc8] sm:$0xff] }
  0x5d   : > { %v1033_v49 = vsel %vm306_vm1, %v589_v7, %v957_v37  ;;  %v1094_v50 = vcombine.low %v3234_v1, %v3254_v11  ;;  %v1146_v51 = vcombine.low %v1022_v38, %v1023_v29  ;;  %v1147_v52 = vcombine.low %v1024_v41, %v1025_v26  ;;  %v1617_v25 = vld [vmem:[%s4156_s2 + $0x48] sm:$0xff] }
  0x5e   : > { %v1197_v53 = vcombine.low %v1034_v48, %v1035_v33  ;;  %v3384_v54 = vadd.s32 4294967295, %v3078_v35  ;;  %v1145_v55 = vcombine.low %v3301_v13, %v3322_v31  ;;  %v1198_v56 = vcombine.low %v1036_v15, %v1037_v36  ;;  %v1631_v13 = vld [vmem:[%s4156_s2 + $0xb8] sm:$0xff] }
  0x5f   : > { %v1180_v58 = vcombine.low %v1030_v28, %v1031_v40  ;;  %v1181_v60 = vcombine.low %v1032_v47, %v1033_v49  ;;  %v1111_v11 = vcombine.low %v1103_v39, %v1110_v44  ;;  %v1171_v5 = vrot.slane %v1163_v45, %v3127_v19 }
  0x60   : > { %v1178_v62 = vrot.slane %v1164_v46, %v3127_v19  ;;  %v1161_v31 = vrot.slane %v1147_v52, %v3127_v19  ;;  %v2634_v2 = vpack.c.bf16 %v1631_v13, %v1630_v63  ;;  %v1205_v18 = vrot.slane %v1197_v53, %v3127_v19 }
  0x61   : > { %v3411_v43 = vadd.s32 1, %v3078_v35  ;;  %v2636_v9 = vpack.c.bf16 %v1615_v3, %v1614_v0  ;;  %v1212_v14 = vrot.slane %v1198_v56, %v3127_v19  ;;  %v1188_v57 = vrot.slane %v1180_v58, %v3127_v19  ;;  %v1632_v35 = vld [vmem:[%s4156_s2 + $0xc0] sm:$0xff] }
  0x62   : > { %v1195_v16 = vrot.slane %v1181_v60, %v3127_v19  ;;  %2635 = vmatprep.subr.bf16.mxu0 %v2634_v2  ;;  %vm1298_vm5 = vcmp.ge.s32.totalorder %v3384_v54, 0  ;;  %v1179_v59 = vcombine.low %v1171_v5, %v1178_v62  ;;  %v2638_v42 = vpack.c.bf16 %v1633_v21, %v1632_v35 }
  0x63   : > { %2637 = vmatpush3.bf16.msra.mxu0 %v2636_v9  ;;  %vm1347_vm7 = vcmp.lt.s32.totalorder %v3411_v43, 8  ;;  %v1213_v39 = vcombine.low %v1205_v18, %v1212_v14 }
  0x64   : > { %v1196_v44 = vcombine.low %v1188_v57, %v1195_v16  ;;  %2639 = vmatprep.subr.bf16.mxu0 %v2638_v42 }
  0x83   : > { %v1235_v6 = vpop.permute.xlu1 %1234  ;;  %v1231_v1 = vpop.permute.xlu0 %1230 }
  0x84   : > { %v1257_v61 = vsel %vm1254_vm4, %v1128_v8, %v1235_v6  ;;  %v1255_v27 = vsel %vm1254_vm4, %v1094_v50, %v1231_v1  ;;  %v1154_v8 = vrot.slane %v1146_v51, %v3127_v19  ;;  %v1616_v19 = vld [vmem:[%s4156_s2 + $0x40] sm:$0xff]  ;;  %v2982_v51 = vmov 0.0  }
  0x85   : > { %v1271_v4 = vrot.slane %v1255_v27, 7  ;;  %v1274_v10 = vrot.slane %v1257_v61, 7  ;;  %v2640_v32 = vpack.c.bf16 %v1617_v25, %v1616_v19 }
  0x86   : > { %v1162_v24 = vcombine.low %v1154_v8, %v1161_v31 }
  0x87   : > { %v1237_v12 = vpop.permute.xlu1 %1236  ;;  %v3417_v17 = vsel %vm306_vm1, 0.0, %v1271_v4  ;;  %v1233_v20 = vpop.permute.xlu0 %1232  ;;  %2641 = vmatpush3.bf16.msra.mxu0 %v2640_v32 }
  0x88   : > { %v1258_v30 = vsel %vm1254_vm4, %v1145_v55, %v1237_v12  ;;  %v1256_v22 = vsel %vm1254_vm4, %v1111_v11, %v1233_v20  ;;  %v3441_v45 = vsel %vm1298_vm5, %v3417_v17, 0.0  ;;  %v1352_v32 = vrot.slane %v3417_v17, 2 }
  0x89   : > { %v1276_v34 = vrot.slane %v1258_v30, 7  ;;  %v1272_v7 = vrot.slane %v1256_v22, 7 }
  0x8b   : > { %v3436_v23 = vsel %vm306_vm1, %v1274_v10, %v1276_v34  ;;  %v1241_v37 = vpop.permute.xlu1 %1240  ;;  %v3446_v29 = vsel %vm306_vm1, %v1271_v4, %v1272_v7  ;;  %v1275_v41 = vsel %vm306_vm1, %v1272_v7, %v1274_v10  ;;  %v1239_v26 = vpop.permute.xlu0 %1238 }
  0x8c   : > { %v1321_v38 = vrot.slane %v3436_v23, 1  ;;  %v1357_v46 = vrot.slane %v3436_v23, 2  ;;  %v1317_v48 = vrot.slane %v3446_v29, 1  ;;  %v1319_v33 = vrot.slane %v1275_v41, 1 }
  0x8d   : > { %v1260_v15 = vsel %vm1254_vm4, %v1179_v59, %v1241_v37  ;;  %v1259_v36 = vsel %vm1254_vm4, %v1162_v24, %v1239_v26  ;;  %v3455_v47 = vsel %vm1298_vm5, %v3446_v29, 0.0  ;;  %v1353_v49 = vrot.slane %v3446_v29, 2 }
  0x8e   : > { %v1280_v28 = vrot.slane %v1260_v15, 7  ;;  %v1278_v40 = vrot.slane %v1259_v36, 7  ;;  %v2726_v52 = vpack.i.bf16 %v2982_v51, %v3455_v47  ;;  %v1355_v53 = vrot.slane %v1275_v41, 2 }
  0x8f   : > { %v1245_v50 = vpop.permute.xlu1 %1244  ;;  %v3463_v6 = vsel %vm319_vm0, %v1317_v48, %v1319_v33  ;;  %v3466_v55 = vsel %vm319_vm0, %v1319_v33, %v1321_v38  ;;  %v1243_v61 = vpop.permute.xlu0 %1242  ;;  %v3509_v16 = vsel %vm1298_vm5, %v1275_v41, 0.0  ;;  %v3529_v59 = vsel %vm1298_vm5, %v3436_v23, 0.0 }
  0x90   : > { %v1279_v56 = vsel %vm306_vm1, %v1276_v34, %v1278_v40  ;;  %v1281_v58 = vsel %vm306_vm1, %v1278_v40, %v1280_v28  ;;  %v1262_v60 = vsel %vm1254_vm4, %v1213_v39, %v1245_v50  ;;  %v2731_v1 = vpack.i.bf16 %v3441_v45, %v3463_v6  ;;  %2727 = vrot.lane.b32.xlu1 %v2726_v52, %s2983_s16  ;;  %v1618_v52 = vld [vmem:[%s4156_s2 + $0x50] sm:$0xff] }
  0x91   : > { %v1323_v11 = vrot.slane %v1279_v56, 1  ;;  %v1359_v5 = vrot.slane %v1279_v56, 2  ;;  %v1361_v62 = vrot.slane %v1281_v58, 2  ;;  %v1284_v63 = vrot.slane %v1262_v60, 7  ;;  %v1637_v60 = vld [vmem:[%s4156_s2 + $0xe8] sm:$0xff] }
  0x92   : > { %v1261_v13 = vsel %vm1254_vm4, %v1196_v44, %v1243_v61  ;;  %v1356_v0 = vsel %vm1351_vm6, %v1353_v49, %v1355_v53  ;;  %2732 = vrot.lane.b32.xlu0 %v2731_v1, %s2984_s17  ;;  %v1358_v27 = vsel %vm1351_vm6, %v1355_v53, %v1357_v46  ;;  %v2736_v3 = vpack.i.bf16 %v3455_v47, %v3466_v55 }
  0x93   : > { %v1282_v8 = vrot.slane %v1261_v13, 7  ;;  %v3482_v31 = vsel %vm1347_vm7, %v1356_v0, 0.0  ;;  %v3486_v2 = vsel %vm1347_vm7, %v1358_v27, 0.0  ;;  %v1325_v4 = vrot.slane %v1281_v58, 1  ;;  %v1639_v13 = vld [vmem:[%s4156_s2 + $0xf8] sm:$0xff] }
  0x94   : > { %v3491_v18 = vsel %vm306_vm1, %v1284_v63, 0.0  ;;  %2610 = vmatprep.mubr.msk.f32.mxu1 %vm1557_vm8, %v3482_v31  ;;  %v1360_v9 = vsel %vm1351_vm6, %v1357_v46, %v1359_v5  ;;  %v1362_v10 = vsel %vm1351_vm6, %v1359_v5, %v1361_v62  ;;  %2737 = vrot.lane.b32.xlu1 %v2736_v3, %s2984_s17  ;;  %v3524_v22 = vsel %vm319_vm0, %v1321_v38, %v1323_v11  ;;  %v1620_v5 = vld [vmem:[%s4156_s2 + $0x60] sm:$0xff] }
  0x95   : > { %v1387_v12 = vrot.slane %v3491_v18, 2  ;;  %v3499_v14 = vsel %vm306_vm1, %v1280_v28, %v1282_v8  ;;  %v3502_v57 = vsel %vm306_vm1, %v1282_v8, %v1284_v63  ;;  %2611 = vmatmul.mubr.msk.f32.vlgmr.msra.gmra.mrb[0].mxu1 %vm1557_vm8, %v3486_v2  ;;  %v3517_v19 = vsel %vm1347_vm7, %v1360_v9, 0.0  ;;  %v1638_v63 = vld [vmem:[%s4156_s2 + $0xf0] sm:$0xff]  ;;  %v1623_v9 = vld [vmem:[%s4156_s2 + $0x78] sm:$0xff] }
  0x96   : > { %v1327_v30 = vrot.slane %v3499_v14, 1  ;;  %v1329_v20 = vrot.slane %v3502_v57, 1  ;;  %v1363_v35 = vrot.slane %v3499_v14, 2  ;;  %v1365_v21 = vrot.slane %v3502_v57, 2  ;;  %2613 = vmatprep.mubr.msk.f32.mxu1 %vm1557_vm8, %v3517_v19 }
  0x97   : > { %v3521_v34 = vsel %vm1347_vm7, %v1362_v10, 0.0  ;;  %v2741_v24 = vpack.i.bf16 %v3509_v16, %v3524_v22  ;;  %v3536_v25 = vsel %vm319_vm0, %v1323_v11, %v1325_v4  ;;  %v3558_v44 = vsel %vm1298_vm5, %v1279_v56, 0.0  ;;  %v1619_v56 = vld [vmem:[%s4156_s2 + $0x58] sm:$0xff] }
  0x98   : > { %v1364_v7 = vsel %vm1351_vm6, %v1361_v62, %v1363_v35  ;;  %v1366_v42 = vsel %vm1351_vm6, %v1363_v35, %v1365_v21  ;;  %v2746_v23 = vpack.i.bf16 %v3529_v59, %v3536_v25  ;;  %v3561_v38 = vsel %vm319_vm0, %v1325_v4, %v1327_v30  ;;  %v1621_v62 = vld [vmem:[%s4156_s2 + $0x68] sm:$0xff]  ;;  %v1622_v4 = vld [vmem:[%s4156_s2 + $0x70] sm:$0xff] }
  0x99   : > { %2614 = vmatmul.mubr.msk.f32.gmra.mrb[2].mxu1 %vm1557_vm8, %v3521_v34  ;;  %v3547_v37 = vsel %vm1347_vm7, %v1364_v7, 0.0  ;;  %v3551_v39 = vsel %vm1347_vm7, %v1366_v42, 0.0  ;;  %2742 = vrot.lane.b32.xlu0 %v2741_v24, %s2984_s17  ;;  %v1388_v46 = vsel %vm1351_vm6, %v1365_v21, %v1387_v12  ;;  %v3567_v41 = vsel %vm319_vm0, %v1327_v30, %v1329_v20 }
  0x9a   : > { %2616 = vmatprep.mubr.msk.f32.mxu1 %vm1557_vm8, %v3547_v37  ;;  %2747 = vrot.lane.b32.xlu1 %v2746_v23, %s2984_s17  ;;  %v2751_v26 = vpack.i.bf16 %v3558_v44, %v3561_v38  ;;  %v1354_v33 = vsel %vm1351_vm6, %v1352_v32, %v1353_v49  ;;  %v1316_v15 = vrot.slane %v3417_v17, 1  ;;  %v3578_v36 = vsel %vm1298_vm5, %v1281_v58, 0.0  ;;  %v1634_v17 = vld [vmem:[%s4156_s2 + $0xd0] sm:$0xff]  ;;  %v1635_v49 = vld [vmem:[%s4156_s2 + $0xd8] sm:$0xff]  ;;  %v1636_v58 = vld [vmem:[%s4156_s2 + $0xe0] sm:$0xff] }
  0x9b   : > { %v3584_v28 = vsel %vm1347_vm7, %v1388_v46, 0.0  ;;  %v2756_v40 = vpack.i.bf16 %v3578_v36, %v3567_v41  ;;  %v1374_v50 = vsel %vm1347_vm7, %v1354_v33, 0.0  ;;  %v2644_v1 = vpack.c.bf16 %v1619_v56, %v1618_v52 }
  0x9c   : > { %v3605_v53 = vsel %vm319_vm0, %v1316_v15, %v1317_v48  ;;  %v2761_v61 = vpack.i.bf16 %v2982_v51, %v1374_v50  ;;  %v2642_v48 = vpack.c.bf16 %v1635_v49, %v1634_v17  ;;  %v2646_v11 = vpack.c.bf16 %v1637_v60, %v1636_v58 }
  0x9d   : > { %2617 = vmatmul.mubr.msk.f32.gmra.mrb[4].mxu1 %vm1557_vm8, %v3551_v39  ;;  %2752 = vrot.lane.b32.xlu0 %v2751_v26, %s2984_s17  ;;  %v2766_v29 = vpack.i.bf16 %v3605_v53, %v3482_v31  ;;  %v2771_v0 = vpack.i.bf16 %v1374_v50, %v3509_v16  ;;  %v2648_v27 = vpack.c.bf16 %v1621_v62, %v1620_v5  ;;  %v3665_v7 = vsel %vm1298_vm5, %v3499_v14, 0.0 }
  0x9e   : > { %2619 = vmatprep.mubr.msk.f32.mxu1 %vm1557_vm8, %v3584_v28  ;;  %2757 = vrot.lane.b32.xlu1 %v2756_v40, %s2984_s17  ;;  %v2781_v8 = vpack.i.bf16 %v3482_v31, %v3529_v59  ;;  %v2650_v3 = vpack.c.bf16 %v1639_v13, %v1638_v63  ;;  %v2776_v10 = vpack.i.bf16 %v3463_v6, %v3486_v2  ;;  %v1383_v42 = vrot.slane %v3491_v18, 1 }
  0x9f   : > { %2643 = vmatprep.subr.bf16.mxu0 %v2642_v48  ;;  %v2652_v12 = vpack.c.bf16 %v1623_v9, %v1622_v4  ;;  %v2786_v31 = vpack.i.bf16 %v3466_v55, %v3517_v19  ;;  %v2791_v30 = vpack.i.bf16 %v3486_v2, %v3558_v44  ;;  %v2801_v35 = vpack.i.bf16 %v3517_v19, %v3578_v36 }
  0xa0   : > { %2645 = vmatpush3.bf16.msra.mxu0 %v2644_v1  ;;  %v2796_v21 = vpack.i.bf16 %v3524_v22, %v3521_v34  ;;  %v2806_v24 = vpack.i.bf16 %v3536_v25, %v3547_v37  ;;  %v2811_v2 = vpack.i.bf16 %v3521_v34, %v3665_v7  ;;  %v1381_v19 = vsel %vm1298_vm5, %v3502_v57, 0.0 }
  0xa1   : > { %2620 = vmatmul.mubr.f32.gmra.mrb[6].mxu1 %v2982_v51  ;;  %2762 = vrot.lane.b32.xlu0 %v2761_v61, %s2985_s14  ;;  %v2826_v32 = vpack.i.bf16 %v3547_v37, %v1381_v19  ;;  %v2816_v14 = vpack.i.bf16 %v3561_v38, %v3551_v39  ;;  %v2831_v23 = vpack.i.bf16 %v3567_v41, %v3584_v28 }
  0xa2   : > { %2767 = vrot.lane.b32.xlu1 %v2766_v29, %s2985_s14  ;;  %2647 = vmatprep.subr.bf16.mxu0 %v2646_v11  ;;  %v3685_v34 = vsel %vm319_vm0, %v1329_v20, %v1383_v42  ;;  %v2836_v37 = vpack.i.bf16 %v1381_v19, %v2982_v51 }
  0xa3   : > { %v2821_v18 = vpack.i.bf16 %v3665_v7, %v3685_v34 }
  0xa4   : > { %2649 = vmatpush3.bf16.msra.mxu0 %v2648_v27 }
  0xa5   : > { %2772 = vrot.lane.b32.xlu0 %v2771_v0, %s2983_s16  ;;  %2651 = vmatprep.subr.bf16.mxu0 %v2650_v3 }
  0xa6   : > { %2782 = vrot.lane.b32.xlu1 %v2781_v8, %s2983_s16 }
  0xa8   : > { %2653 = vmatpush3.bf16.msra.mxu0 %v2652_v12 }
  0xa9   : > { %2777 = vrot.lane.b32.xlu0 %v2776_v10, %s2985_s14 }
  0xaa   : > { %2787 = vrot.lane.b32.xlu1 %v2786_v31, %s2985_s14 }
  0xad   : > { %2792 = vrot.lane.b32.xlu0 %v2791_v30, %s2983_s16 }
  0xae   : > { %2802 = vrot.lane.b32.xlu1 %v2801_v35, %s2983_s16 }
  0xb1   : > { %2797 = vrot.lane.b32.xlu0 %v2796_v21, %s2985_s14 }
  0xb2   : > { %2807 = vrot.lane.b32.xlu1 %v2806_v24, %s2985_s14 }
  0xb5   : > { %2812 = vrot.lane.b32.xlu0 %v2811_v2, %s2983_s16 }
  0xb6   : > { %2827 = vrot.lane.b32.xlu1 %v2826_v32, %s2983_s16 }
  0xb9   : > { %2817 = vrot.lane.b32.xlu0 %v2816_v14, %s2985_s14 }
  0xba   : > { %2832 = vrot.lane.b32.xlu1 %v2831_v23, %s2985_s14 }
  0xbd   : > { %2822 = vrot.lane.b32.xlu0 %v2821_v18, %s2984_s17 }
  0xbe   : > { %2837 = vrot.lane.b32.xlu1 %v2836_v37, %s2984_s17 }
  0xc1   : > { %1444 = vrot.lane.b32.xlu0 %v3551_v39, %s2983_s16 }
 0x102   : > { %v3696_v57 = vpop.permute.xlu1 %2727 }
 0x103   : > { %v2730_v39 = vunpack.i.h.bf16 %v3696_v57  ;;  %v2729_v52 = vunpack.i.l.bf16 %v3696_v57 }
 0x104   : > { %v2733_v20 = vpop.permute.xlu0 %2732 }
 0x105   : > { %v2735_v60 = vunpack.i.h.bf16 %v2733_v20  ;;  %v2734_v61 = vunpack.i.l.bf16 %v2733_v20 }
 0x106   : > { %v2738_v46 = vpop.permute.xlu1 %2737 }
 0x107   : > { %v2739_v3 = vunpack.i.l.bf16 %v2738_v46  ;;  %v2740_v10 = vunpack.i.h.bf16 %v2738_v46 }
 0x10b   : > { %v2743_v26 = vpop.permute.xlu0 %2742 }
 0x10c   : > { %v3698_v33 = vpop.permute.xlu1 %2747  ;;  %v2745_v42 = vunpack.i.h.bf16 %v2743_v26  ;;  %v2744_v32 = vunpack.i.l.bf16 %v2743_v26 }
 0x10f   : > { %v3700_v15 = vpop.permute.xlu0 %2752 }
 0x110   : > { %v3702_v28 = vpop.permute.xlu1 %2757 }
 0x113   : > { %v3704_v40 = vpop.permute.xlu0 %2762 }
 0x114   : > { %v2765_v50 = vunpack.i.h.bf16 %v3704_v40  ;;  %v2764_v17 = vunpack.i.l.bf16 %v3704_v40  ;;  %v2768_v49 = vpop.permute.xlu1 %2767 }
 0x115   : > { %v2770_v56 = vunpack.i.h.bf16 %v2768_v49  ;;  %v2769_v58 = vunpack.i.l.bf16 %v2768_v49 }
 0x116   : > { %v1558_v29 = vsel %vm1557_vm8, 0.0, %v2765_v50  ;;  %v1584_v48 = vsel %vm1557_vm8, %v3605_v53, %v2764_v17 }
 0x117   : > { %v2773_v1 = vpop.permute.xlu0 %2772  ;;  %v1592_v11 = vsel %vm1566_vm9, %v1584_v48, %v2729_v52  ;;  %v1567_v5 = vsel %vm1566_vm9, %v1558_v29, %v2730_v39  ;;  %v1585_v62 = vsel %vm1557_vm8, %v3463_v6, %v2769_v58  ;;  %v1559_v63 = vsel %vm1557_vm8, %v3441_v45, %v2770_v56 }
 0x118   : > { %v2775_v13 = vunpack.i.h.bf16 %v2773_v1  ;;  %v2774_v0 = vunpack.i.l.bf16 %v2773_v1  ;;  %v1600_v27 = vsel %vm1575_vm10, %v1592_v11, %v2734_v61  ;;  %v2783_v8 = vpop.permute.xlu1 %2782  ;;  %v1576_v53 = vsel %vm1575_vm10, %v1567_v5, %v2735_v60 }
 0x119   : > { %1731 = vmatprep.mubr.f32.mxu0 %v1600_v27  ;;  %v2785_v31 = vunpack.i.h.bf16 %v2783_v8  ;;  %v2784_v21 = vunpack.i.l.bf16 %v2783_v8  ;;  %v2754_v27 = vunpack.i.l.bf16 %v3700_v15 }
 0x11a   : > { %1732 = vmatmul.mubr.f32.vlgmr.msra.gmra.mrb[0].mxu0 %v1576_v53  ;;  %v1593_v4 = vsel %vm1566_vm9, %v1585_v62, %v2774_v0  ;;  %v1568_v9 = vsel %vm1566_vm9, %v1559_v63, %v2775_v13  ;;  %v2755_v0 = vunpack.i.h.bf16 %v3700_v15 }
 0x11b   : > { %v2778_v12 = vpop.permute.xlu0 %2777  ;;  %v1601_v6 = vsel %vm1575_vm10, %v1593_v4, %v2739_v3  ;;  %v1577_v19 = vsel %vm1575_vm10, %v1568_v9, %v2740_v10 }
 0x11c   : > { %v2780_v45 = vunpack.i.h.bf16 %v2778_v12  ;;  %v2779_v30 = vunpack.i.l.bf16 %v2778_v12  ;;  %1736 = vmatprep.mubr.f32.mxu0 %v1601_v6  ;;  %v2788_v35 = vpop.permute.xlu1 %2787 }
 0x11d   : > { %v2790_v24 = vunpack.i.h.bf16 %v2788_v35  ;;  %v2789_v2 = vunpack.i.l.bf16 %v2788_v35 }
 0x11e   : > { %1737 = vmatmul.mubr.f32.gmra.mrb[2].mxu0 %v1577_v19  ;;  %v1586_v14 = vsel %vm1557_vm8, %v3466_v55, %v2779_v30  ;;  %v1560_v23 = vsel %vm1557_vm8, %v3455_v47, %v2780_v45  ;;  %v2749_v47 = vunpack.i.l.bf16 %v3698_v33 }
 0x11f   : > { %v2793_v18 = vpop.permute.xlu0 %2792  ;;  %v1594_v37 = vsel %vm1566_vm9, %v1586_v14, %v2784_v21  ;;  %v1569_v20 = vsel %vm1566_vm9, %v1560_v23, %v2785_v31  ;;  %v1587_v46 = vsel %vm1557_vm8, %v3524_v22, %v2789_v2  ;;  %v1561_v17 = vsel %vm1557_vm8, %v3509_v16, %v2790_v24 }
 0x120   : > { %v2795_v49 = vunpack.i.h.bf16 %v2793_v18  ;;  %v2794_v26 = vunpack.i.l.bf16 %v2793_v18  ;;  %v2803_v52 = vpop.permute.xlu1 %2802  ;;  %v1602_v56 = vsel %vm1575_vm10, %v1594_v37, %v2744_v32  ;;  %v1578_v55 = vsel %vm1575_vm10, %v1569_v20, %v2745_v42 }
 0x121   : > { %1741 = vmatprep.mubr.f32.mxu0 %v1602_v56  ;;  %v2750_v22 = vunpack.i.h.bf16 %v3698_v33  ;;  %v2805_v29 = vunpack.i.h.bf16 %v2803_v52  ;;  %v2804_v5 = vunpack.i.l.bf16 %v2803_v52 }
 0x122   : > { %1742 = vmatmul.mubr.f32.gmra.mrb[4].mxu0 %v1578_v55  ;;  %v1595_v58 = vsel %vm1566_vm9, %v1587_v46, %v2794_v26  ;;  %v1570_v60 = vsel %vm1566_vm9, %v1561_v17, %v2795_v49 }
 0x123   : > { %v2798_v61 = vpop.permute.xlu0 %2797  ;;  %v1603_v16 = vsel %vm1575_vm10, %v1595_v58, %v2749_v47  ;;  %v1579_v13 = vsel %vm1575_vm10, %v1570_v60, %v2750_v22 }
 0x124   : > { %v2800_v48 = vunpack.i.h.bf16 %v2798_v61  ;;  %v2799_v1 = vunpack.i.l.bf16 %v2798_v61  ;;  %1746 = vmatprep.mubr.f32.mxu0 %v1603_v16  ;;  %v2808_v11 = vpop.permute.xlu1 %2807 }
 0x125   : > { %v2810_v62 = vunpack.i.h.bf16 %v2808_v11  ;;  %v2809_v63 = vunpack.i.l.bf16 %v2808_v11 }
 0x126   : > { %1747 = vmatmul.mubr.f32.gmra.mrb[6].mxu0 %v1579_v13  ;;  %v1588_v33 = vsel %vm1557_vm8, %v3536_v25, %v2799_v1  ;;  %v1562_v8 = vsel %vm1557_vm8, %v3529_v59, %v2800_v48  ;;  %v2759_v59 = vunpack.i.l.bf16 %v3702_v28  ;;  %v2986_v13 = vmov 0.0|0.0  }
 0x127   : > { %v2813_v53 = vpop.permute.xlu0 %2812  ;;  %v1596_v3 = vsel %vm1566_vm9, %v1588_v33, %v2804_v5  ;;  %v1571_v4 = vsel %vm1566_vm9, %v1562_v8, %v2805_v29  ;;  %v1589_v9 = vsel %vm1557_vm8, %v3561_v38, %v2809_v63  ;;  %v1563_v10 = vsel %vm1557_vm8, %v3558_v44, %v2810_v62  ;;  %v2256_v5 = vld [vmem:[%s4158_s4] sm:$0xff]  ;;  %v2257_v62 = vld [vmem:[%s4158_s4 + $0x8] sm:$0xff]  ;;  %v2258_v63 = vld [vmem:[%s4158_s4 + $0x10] sm:$0xff]  ;;  %2689 = vmatprep.subr.bf16.mxu1 %v2986_v13 }
 0x128   : > { %v2815_v12 = vunpack.i.h.bf16 %v2813_v53  ;;  %v2814_v15 = vunpack.i.l.bf16 %v2813_v53  ;;  %v2828_v6 = vpop.permute.xlu1 %2827  ;;  %v1604_v31 = vsel %vm1575_vm10, %v1596_v3, %v2754_v27  ;;  %v1580_v25 = vsel %vm1575_vm10, %v1571_v4, %v2755_v0  ;;  %v2259_v27 = vld [vmem:[%s4158_s4 + $0x18] sm:$0xff]  ;;  %2662 = vmatprep.subr.bf16.mxu0 %v2986_v13  ;;  %v2260_v8 = vld [vmem:[%s4158_s4 + $0x20] sm:$0xff]  ;;  %v2261_v53 = vld [vmem:[%s4158_s4 + $0x28] sm:$0xff] }
 0x129   : > { %1751 = vmatprep.mubr.f32.mxu0 %v1604_v31  ;;  %v2760_v38 = vunpack.i.h.bf16 %v3702_v28  ;;  %v2830_v23 = vunpack.i.h.bf16 %v2828_v6  ;;  %v2829_v18 = vunpack.i.l.bf16 %v2828_v6  ;;  %v2663_v0 = vpack.c.bf16 %v2257_v62, %v2256_v5  ;;  %v2262_v4 = vld [vmem:[%s4158_s4 + $0x30] sm:$0xff] }
 0x12a   : > { %1752 = vmatmul.mubr.f32.gmra.mrb[8].mxu0 %v1580_v25  ;;  %v1597_v45 = vsel %vm1566_vm9, %v1589_v9, %v2814_v15  ;;  %v1572_v30 = vsel %vm1566_vm9, %v1563_v10, %v2815_v12  ;;  %v2666_v33 = vpack.c.bf16 %v2259_v27, %v2258_v63  ;;  %v2669_v3 = vpack.c.bf16 %v2261_v53, %v2260_v8  ;;  %v2263_v9 = vld [vmem:[%s4158_s4 + $0x38] sm:$0xff]  ;;  %v2264_v12 = vld [vmem:[%s4158_s4 + $0x40] sm:$0xff]  ;;  %v2265_v15 = vld [vmem:[%s4158_s4 + $0x48] sm:$0xff] }
 0x12b   : > { %v2818_v35 = vpop.permute.xlu0 %2817  ;;  %v1605_v44 = vsel %vm1575_vm10, %v1597_v45, %v2759_v59  ;;  %v1581_v42 = vsel %vm1575_vm10, %v1572_v30, %v2760_v38  ;;  %2698 = vmatpush1.bf16.msra.mxu1 %v2663_v0  ;;  %2664 = vmatpush1.bf16.msra.mxu0 %v2663_v0  ;;  %v2672_v10 = vpack.c.bf16 %v2263_v9, %v2262_v4  ;;  %v3848_v25 = vld [vmem:[%s4157_s3] ss:$0 sm:$0xff] }
 0x12c   : > { %v2820_v21 = vunpack.i.h.bf16 %v2818_v35  ;;  %v2819_v24 = vunpack.i.l.bf16 %v2818_v35  ;;  %1756 = vmatprep.mubr.f32.mxu0 %v1605_v44  ;;  %v2833_v2 = vpop.permute.xlu1 %2832  ;;  %2690 = vmatprep.subr.bf16.mxu1 %v2986_v13  ;;  %v2675_v6 = vpack.c.bf16 %v2265_v15, %v2264_v12  ;;  %v2268_v53 = vld [vmem:[%s4158_s4 + $0x60] sm:$0xff]  ;;  %v2270_v12 = vld [vmem:[%s4158_s4 + $0x70] sm:$0xff]  ;;  %v2271_v15 = vld [vmem:[%s4158_s4 + $0x78] sm:$0xff] }
 0x12d   : > { %v2834_v19 = vunpack.i.l.bf16 %v2833_v2  ;;  %v2835_v28 = vunpack.i.h.bf16 %v2833_v2  ;;  %2665 = vmatprep.subr.bf16.mxu0 %v2986_v13 }
 0x12e   : > { %1757 = vmatmul.mubr.f32.gmra.mrb[10].mxu0 %v1581_v42  ;;  %v1590_v32 = vsel %vm1557_vm8, %v3567_v41, %v2819_v24  ;;  %v1564_v14 = vsel %vm1557_vm8, %v3578_v36, %v2820_v21 }
 0x12f   : > { %v2823_v37 = vpop.permute.xlu0 %2822  ;;  %v1591_v20 = vsel %vm1557_vm8, %v3685_v34, %v2834_v19  ;;  %v1598_v52 = vsel %vm1566_vm9, %v1590_v32, %v2829_v18  ;;  %v1573_v41 = vsel %vm1566_vm9, %v1564_v14, %v2830_v23  ;;  %v1565_v58 = vsel %vm1557_vm8, %v3665_v7, %v2835_v28  ;;  %2699 = vmatpush1.bf16.msra.mxu1 %v2666_v33 }
 0x130   : > { %v2825_v46 = vunpack.i.h.bf16 %v2823_v37  ;;  %v2824_v17 = vunpack.i.l.bf16 %v2823_v37  ;;  %v3773_v49 = vpop.permute.xlu1 %2837  ;;  %v1599_v55 = vsel %vm1566_vm9, %v1591_v20, %v2730_v39  ;;  %2667 = vmatpush1.bf16.msra.mxu0 %v2666_v33  ;;  %2691 = vmatprep.subr.bf16.mxu1 %v2986_v13 }
 0x131   : > { %v2839_v26 = vunpack.i.l.bf16 %v3773_v49  ;;  %v2840_v34 = vunpack.i.h.bf16 %v3773_v49  ;;  %2668 = vmatprep.subr.bf16.mxu0 %v2986_v13 }
 0x132   : > { %v1606_v56 = vsel %vm1575_vm10, %v1598_v52, %v2824_v17  ;;  %v1582_v36 = vsel %vm1575_vm10, %v1573_v41, %v2825_v46  ;;  %v2266_v46 = vld [vmem:[%s4158_s4 + $0x50] sm:$0xff]  ;;  %v2267_v17 = vld [vmem:[%s4158_s4 + $0x58] sm:$0xff] }
 0x133   : > { %v1445_v47 = vpop.permute.xlu0 %1444  ;;  %1761 = vmatprep.mubr.f32.mxu0 %v1606_v56  ;;  %v1607_v60 = vsel %vm1575_vm10, %v1599_v55, %v2839_v26  ;;  %2700 = vmatpush1.bf16.msra.mxu1 %v2669_v3  ;;  %v2678_v41 = vpack.c.bf16 %v2267_v17, %v2266_v46 }
 0x134   : > { %v1574_v22 = vsel %vm1566_vm9, %v1565_v58, %v1445_v47  ;;  %1762 = vmatmul.mubr.f32.gmra.mrb[12].mxu0 %v1582_v36  ;;  %2692 = vmatprep.subr.bf16.mxu1 %v2986_v13 }
 0x135   : > { %1766 = vmatprep.mubr.f32.mxu0 %v1607_v60  ;;  %v1583_v61 = vsel %vm1575_vm10, %v1574_v22, %v2840_v34  ;;  %2670 = vmatpush1.bf16.msra.mxu0 %v2669_v3  ;;  %v2269_v3 = vld [vmem:[%s4158_s4 + $0x68] sm:$0xff] }
 0x136   : > { %2671 = vmatprep.subr.bf16.mxu0 %v2986_v13 }
 0x137   : > { %2701 = vmatpush1.bf16.msra.mxu1 %v2672_v10 }
 0x138   : > { %1767 = vmatmul.mubr.f32.gmra.mrb[14].mxu0 %v1583_v61  ;;  %2693 = vmatprep.subr.bf16.mxu1 %v2986_v13 }
 0x139   : > { %2673 = vmatpush1.bf16.msra.mxu0 %v2672_v10  ;;  %v2681_v10 = vpack.c.bf16 %v2269_v3, %v2268_v53 }
 0x13a   : > { %2674 = vmatprep.subr.bf16.mxu0 %v2986_v13 }
 0x13b   : > { %2702 = vmatpush1.bf16.msra.mxu1 %v2675_v6 }
 0x13c   : > { %2694 = vmatprep.subr.bf16.mxu1 %v2986_v13 }
 0x13d   : > { %2676 = vmatpush1.bf16.msra.mxu0 %v2675_v6 }
 0x13e   : > { %2677 = vmatprep.subr.bf16.mxu0 %v2986_v13 }
 0x13f   : > { %2703 = vmatpush1.bf16.msra.mxu1 %v2678_v41 }
 0x140   : > { %2695 = vmatprep.subr.bf16.mxu1 %v2986_v13 }
 0x141   : > { %2679 = vmatpush1.bf16.msra.mxu0 %v2678_v41 }
 0x142   : > { %2680 = vmatprep.subr.bf16.mxu0 %v2986_v13 }
 0x143   : > { %2704 = vmatpush1.bf16.msra.mxu1 %v2681_v10 }
 0x144   : > { %2696 = vmatprep.subr.bf16.mxu1 %v2986_v13 }
 0x145   : > { %2682 = vmatpush1.bf16.msra.mxu0 %v2681_v10 }
 0x146   : > { %2683 = vmatprep.subr.bf16.mxu0 %v2986_v13 }
 0x168   : > { %v2612_v57 = vpop.f32.mrb[0].mxu1 }
 0x169   : > { %v1838_v39 = vpop.f32.mrb[1].mxu1 }
 0x16c   : > { %v3791_v16 = vpop.f32.mrb[2].mxu1 }
 0x16d   : > { %v3793_v29 = vpop.f32.mrb[3].mxu1 }
 0x170   : > { %v3795_v48 = vpop.f32.mrb[4].mxu1 }
 0x171   : > { %v3797_v7 = vpop.f32.mrb[5].mxu1 }
 0x174   : > { %v3799_v1 = vpop.f32.mrb[6].mxu1 }
 0x175   : > { %v3801_v11 = vpop.f32.mrb[7].mxu1 }
 0x1ed   : > { %v2566_v31 = vpop.f32.mrb[0].mxu0 }
 0x1ee   : > { %v2567_v59 = vpop.f32.mrb[1].mxu0 }
 0x1ef   : > { %v2568_v45 = vadd.f32 %v2567_v59, %v2566_v31 }
 0x1f1   : > { %v1734_v30 = vadd.f32 %v2568_v45, %v3848_v25  ;;  %v2569_v38 = vpop.f32.mrb[2].mxu0 }
 0x1f2   : > { %v2570_v35 = vpop.f32.mrb[3].mxu0 }
 0x1f3   : > { %v1839_v44 = vadd.f32 %v1838_v39, %v1734_v30  ;;  %v2571_v21 = vadd.f32 %v2570_v35, %v2569_v38  ;;  %v2684_v30 = vpack.c.bf16 %v2271_v15, %v2270_v12 }
 0x1f5   : > { %vm1877_vm11 = vcmp.ge.f32.partialorder %v1839_v44, 0.0  ;;  %v1885_v24 = vmul.f32 0.01, %v1839_v44  ;;  %v1739_v2 = vadd.f32 %v2571_v21, %v3848_v25  ;;  %v2572_v19 = vpop.f32.mrb[4].mxu0  ;;  %2705 = vmatpush1.bf16.msra.mxu1 %v2684_v30  ;;  %2685 = vmatpush1.bf16.msra.mxu0 %v2684_v30 }
 0x1f6   : > { %v2573_v42 = vpop.f32.mrb[5].mxu0  ;;  %2697 = vmatprep.subr.bf16.mxu1 %v2986_v13  ;;  %2686 = vmatprep.subr.bf16.mxu0 %v2986_v13 }
 0x1f7   : > { %v1893_v32 = vsel %vm1877_vm11, %v1839_v44, %v1885_v24  ;;  %v1844_v14 = vadd.f32 %v2612_v57, %v1739_v2  ;;  %v2574_v23 = vadd.f32 %v2573_v42, %v2572_v19 }
 0x1f8   : > { %v1909_v18 = vrot.slane %v1893_v32, 7 }
 0x1f9   : > { %vm1878_vm12 = vcmp.ge.f32.partialorder %v1844_v14, 0.0  ;;  %v1886_v28 = vmul.f32 0.01, %v1844_v14  ;;  %v1744_v37 = vadd.f32 %v2574_v23, %v3848_v25  ;;  %v2575_v20 = vpop.f32.mrb[6].mxu0 }
 0x1fa   : > { %v2576_v52 = vpop.f32.mrb[7].mxu0  ;;  %v3860_v56 = vsel %vm306_vm1, 0.0, %v1909_v18 }
 0x1fb   : > { %v1894_v36 = vsel %vm1878_vm12, %v1844_v14, %v1886_v28  ;;  %v1849_v55 = vadd.f32 %v3793_v29, %v1744_v37  ;;  %v2577_v34 = vadd.f32 %v2576_v52, %v2575_v20  ;;  %v1972_v39 = vrot.slane %v3860_v56, 2 }
 0x1fc   : > { %v1910_v47 = vrot.slane %v1894_v36, 7  ;;  %v1943_v63 = vrot.slane %v3860_v56, 1 }
 0x1fd   : > { %vm1879_vm13 = vcmp.ge.f32.partialorder %v1849_v55, 0.0  ;;  %v1887_v58 = vmul.f32 0.01, %v1849_v55  ;;  %v1749_v60 = vadd.f32 %v2577_v34, %v3848_v25  ;;  %v2578_v22 = vpop.f32.mrb[8].mxu0 }
 0x1fe   : > { %v2579_v61 = vpop.f32.mrb[9].mxu0  ;;  %v1911_v57 = vsel %vm306_vm1, %v1909_v18, %v1910_v47 }
 0x1ff   : > { %v1895_v5 = vsel %vm1879_vm13, %v1849_v55, %v1887_v58  ;;  %v1854_v29 = vadd.f32 %v3791_v16, %v1749_v60  ;;  %v2580_v62 = vadd.f32 %v2579_v61, %v2578_v22  ;;  %v3872_v27 = vsel %vm1298_vm5, %v1911_v57, 0.0 }
 0x200   : > { %v1912_v0 = vrot.slane %v1895_v5, 7  ;;  %v1973_v33 = vrot.slane %v1911_v57, 2  ;;  %v1944_v8 = vrot.slane %v1911_v57, 1 }
 0x201   : > { %vm1880_vm14 = vcmp.ge.f32.partialorder %v1854_v29, 0.0  ;;  %v1888_v16 = vmul.f32 0.01, %v1854_v29  ;;  %v1754_v4 = vadd.f32 %v2580_v62, %v3848_v25  ;;  %v2581_v9 = vpop.f32.mrb[10].mxu0 }
 0x202   : > { %v2582_v6 = vpop.f32.mrb[11].mxu0  ;;  %v1913_v31 = vsel %vm306_vm1, %v1910_v47, %v1912_v0  ;;  %v1974_v59 = vsel %vm1351_vm6, %v1972_v39, %v1973_v33  ;;  %v3890_v45 = vsel %vm319_vm0, %v1943_v63, %v1944_v8 }
 0x203   : > { %v1896_v38 = vsel %vm1880_vm14, %v1854_v29, %v1888_v16  ;;  %v1859_v35 = vadd.f32 %v3797_v7, %v1754_v4  ;;  %v2583_v44 = vadd.f32 %v2582_v6, %v2581_v9  ;;  %v3895_v21 = vsel %vm1298_vm5, %v1913_v31, 0.0 }
 0x204   : > { %v1914_v24 = vrot.slane %v1896_v38, 7  ;;  %v2841_v2 = vpack.i.bf16 %v3895_v21, %v3872_v27  ;;  %v1975_v19 = vrot.slane %v1913_v31, 2  ;;  %v1946_v32 = vrot.slane %v1913_v31, 1 }
 0x205   : > { %vm1881_vm15 = vcmp.ge.f32.partialorder %v1859_v35, 0.0  ;;  %v1889_v42 = vmul.f32 0.01, %v1859_v35  ;;  %v1759_v7 = vadd.f32 %v2583_v44, %v3848_v25  ;;  %v3906_v23 = vsel %vm1347_vm7, %v1974_v59, 0.0 }
 0x206   : > { %2842 = vrot.lane.b32.xlu0 %v2841_v2, %s2987_s27  ;;  %v1976_v14 = vsel %vm1351_vm6, %v1973_v33, %v1975_v19  ;;  %v1915_v18 = vsel %vm306_vm1, %v1912_v0, %v1914_v24  ;;  %v3913_v17 = vsel %vm319_vm0, %v1944_v8, %v1946_v32 }
 0x207   : > { %v1897_v28 = vsel %vm1881_vm15, %v1859_v35, %v1889_v42  ;;  %v1864_v37 = vadd.f32 %v3795_v48, %v1759_v7  ;;  %v2584_v20 = vpop.f32.mrb[12].mxu0  ;;  %v1995_v46 = vsel %vm1347_vm7, %v1976_v14, 0.0  ;;  %v2846_v55 = vpack.i.bf16 %v3913_v17, %v3890_v45 }
 0x208   : > { %v1916_v52 = vrot.slane %v1897_v28, 7  ;;  %2522 = vmatprep.mubr.msk.f32.mxu0 %vm1254_vm4, %v1995_v46  ;;  %v2585_v41 = vpop.f32.mrb[13].mxu0  ;;  %v2851_v36 = vpack.i.bf16 %v1995_v46, %v3906_v23  ;;  %v1977_v34 = vrot.slane %v1915_v18, 2  ;;  %v3922_v58 = vsel %vm1298_vm5, %v1915_v18, 0.0 }
 0x209   : > { %vm1882_vm2 = vcmp.ge.f32.partialorder %v1864_v37, 0.0  ;;  %v1890_v48 = vmul.f32 0.01, %v1864_v37  ;;  %v2586_v47 = vadd.f32 %v2585_v41, %v2584_v20  ;;  %v1948_v22 = vrot.slane %v1915_v18, 1 }
 0x20a   : > { %2852 = vrot.lane.b32.xlu1 %v2851_v36, %s2985_s14  ;;  %2847 = vrot.lane.b32.xlu0 %v2846_v55, %s2979_s11  ;;  %v1978_v60 = vsel %vm1351_vm6, %v1975_v19, %v1977_v34  ;;  %v1917_v61 = vsel %vm306_vm1, %v1914_v24, %v1916_v52  ;;  %v2856_v0 = vpack.i.bf16 %v3922_v58, %v3895_v21  ;;  %v2273_v24 = vld [vmem:[%s4158_s4 + $0x88] sm:$0xff] }
 0x20b   : > { %v1898_v57 = vsel %vm1882_vm2, %v1864_v37, %v1890_v48  ;;  %v2587_v39 = vpop.f32.mrb[14].mxu0  ;;  %v1996_v5 = vsel %vm1347_vm7, %v1978_v60, 0.0  ;;  %v1764_v29 = vadd.f32 %v2586_v47, %v3848_v25  ;;  %v1950_v62 = vrot.slane %v1917_v61, 1 }
 0x20c   : > { %v1918_v63 = vrot.slane %v1898_v57, 7  ;;  %2523 = vmatprep.mubr.msk.f32.mxu1 %vm1254_vm4, %v1996_v5  ;;  %v2588_v13 = vpop.f32.mrb[15].mxu0  ;;  %v2866_v33 = vpack.i.bf16 %v1996_v5, %v1995_v46  ;;  %v1949_v8 = vsel %vm319_vm0, %v1946_v32, %v1948_v22  ;;  %v1979_v10 = vrot.slane %v1917_v61, 2 }
 0x20d   : > { %v2589_v53 = vadd.f32 %v2588_v13, %v2587_v39  ;;  %v1869_v3 = vadd.f32 %v3801_v11, %v1764_v29  ;;  %v2861_v16 = vpack.i.bf16 %v1949_v8, %v3913_v17  ;;  %v3939_v4 = vsel %vm319_vm0, %v1948_v22, %v1950_v62 }
 0x20e   : > { %2857 = vrot.lane.b32.xlu1 %v2856_v0, %s2984_s17  ;;  %2867 = vrot.lane.b32.xlu0 %v2866_v33, %s2988_s28  ;;  %v2876_v9 = vpack.i.bf16 %v3939_v4, %v1949_v8  ;;  %v1919_v6 = vsel %vm306_vm1, %v1916_v52, %v1918_v63  ;;  %v1980_v11 = vsel %vm1351_vm6, %v1977_v34, %v1979_v10  ;;  %v3950_v35 = vsel %vm1298_vm5, %v1917_v61, 0.0 }
 0x20f   : > { %v1769_v12 = vadd.f32 %v2589_v53, %v3848_v25  ;;  %vm1883_vm3 = vcmp.ge.f32.partialorder %v1869_v3, 0.0  ;;  %v1891_v15 = vmul.f32 0.01, %v1869_v3  ;;  %v1981_v31 = vrot.slane %v1919_v6, 2  ;;  %v2272_v25 = vld [vmem:[%s4158_s4 + $0x80] sm:$0xff] }
 0x210   : > { %v1952_v59 = vrot.slane %v1919_v6, 1  ;;  %v3954_v44 = vsel %vm1347_vm7, %v1980_v11, 0.0  ;;  %v2871_v14 = vpack.i.bf16 %v3950_v35, %v3922_v58  ;;  %v2687_v28 = vpack.c.bf16 %v2273_v24, %v2272_v25 }
 0x211   : > { %v1874_v30 = vadd.f32 %v3799_v1, %v1769_v12  ;;  %v1899_v38 = vsel %vm1883_vm3, %v1869_v3, %v1891_v15  ;;  %v1982_v1 = vsel %vm1351_vm6, %v1979_v10, %v1981_v31  ;;  %v2886_v18 = vpack.i.bf16 %v3954_v44, %v1996_v5 }
 0x212   : > { %v1920_v2 = vrot.slane %v1899_v38, 7  ;;  %2862 = vrot.lane.b32.xlu1 %v2861_v16, %s2983_s16  ;;  %2877 = vrot.lane.b32.xlu0 %v2876_v9, %s2989_s10  ;;  %v1953_v19 = vsel %vm319_vm0, %v1950_v62, %v1952_v59  ;;  %v3973_v20 = vsel %vm1298_vm5, %v1919_v6, 0.0  ;;  %v3984_v60 = vsel %vm1347_vm7, %v1982_v1, 0.0 }
 0x213   : > { %vm1884_vm11 = vcmp.ge.f32.partialorder %v1874_v30, 0.0  ;;  %v1892_v42 = vmul.f32 0.01, %v1874_v30  ;;  %v2896_v7 = vpack.i.bf16 %v1953_v19, %v3939_v4  ;;  %2706 = vmatpush1.bf16.msra.mxu1 %v2687_v28  ;;  %2688 = vmatpush1.bf16.msra.mxu0 %v2687_v28  ;;  %v2891_v34 = vpack.i.bf16 %v3973_v20, %v3950_v35 }
 0x214   : > { %v1921_v32 = vsel %vm306_vm1, %v1918_v63, %v1920_v2  ;;  %v2901_v62 = vpack.i.bf16 %v3984_v60, %v3954_v44  ;;  %v1935_v15 = vsel %vm1298_vm5, %v3860_v56, 0.0  ;;  %v2966_v56 = vpack.i.bf16 %v2982_v51, %v3913_v17 }
 0x215   : > { %v1900_v37 = vsel %vm1884_vm11, %v1874_v30, %v1892_v42  ;;  %v1954_v46 = vrot.slane %v1921_v32, 1  ;;  %v1983_v52 = vrot.slane %v1921_v32, 2  ;;  %v3996_v0 = vsel %vm1298_vm5, %v1921_v32, 0.0 }
 0x216   : > { %v1922_v41 = vrot.slane %v1900_v37, 7  ;;  %2872 = vrot.lane.b32.xlu1 %v2871_v14, %s2987_s27  ;;  %2887 = vrot.lane.b32.xlu0 %v2886_v18, %s2985_s14  ;;  %v2906_v16 = vpack.i.bf16 %v3996_v0, %v3973_v20 }
 0x217   : > { %v1955_v36 = vsel %vm319_vm0, %v1952_v59, %v1954_v46  ;;  %v1984_v55 = vsel %vm1351_vm6, %v1981_v31, %v1983_v52 }
 0x218   : > { %v2911_v48 = vpack.i.bf16 %v1955_v36, %v1953_v19  ;;  %v1923_v47 = vsel %vm306_vm1, %v1920_v2, %v1922_v41  ;;  %v1934_v61 = vsel %vm306_vm1, %v1922_v41, 0.0  ;;  %v4006_v4 = vsel %vm1347_vm7, %v1984_v55, 0.0 }
 0x219   : > { %v1985_v22 = vrot.slane %v1923_v47, 2  ;;  %v1956_v57 = vrot.slane %v1923_v47, 1  ;;  %v2003_v39 = vrot.slane %v1934_v61, 1  ;;  %v2007_v29 = vrot.slane %v1934_v61, 2 }
 0x21a   : > { %2882 = vrot.lane.b32.xlu1 %v2876_v9, %s2979_s11  ;;  %2892 = vrot.lane.b32.xlu0 %v2891_v34, %s2984_s17  ;;  %v2001_v9 = vsel %vm1298_vm5, %v1923_v47, 0.0  ;;  %vm2230_vm1 = vcmask 654336   ;;  %vm2247_vm5 = vcmask 916480  }
 0x21b   : > { %v1986_v5 = vsel %vm1351_vm6, %v1983_v52, %v1985_v22  ;;  %v1957_v63 = vsel %vm319_vm0, %v1954_v46, %v1956_v57  ;;  %v2004_v13 = vsel %vm319_vm0, %v1956_v57, %v2003_v39  ;;  %v2008_v3 = vsel %vm1351_vm6, %v1985_v22, %v2007_v29 }
 0x21c   : > { %v2941_v33 = vpack.i.bf16 %v2004_v13, %v1957_v63  ;;  %v2936_v8 = vpack.i.bf16 %v1957_v63, %v1955_v36  ;;  %v2956_v53 = vpack.i.bf16 %v2004_v13, %v3890_v45  ;;  %v2921_v45 = vpack.i.bf16 %v4006_v4, %v3984_v60 }
 0x21d   : > { %v2926_v10 = vpack.i.bf16 %v2001_v9, %v3996_v0  ;;  %v4019_v12 = vsel %vm1347_vm7, %v1986_v5, 0.0  ;;  %v2931_v6 = vpack.i.bf16 %v2001_v9, %v1935_v15  ;;  %v2946_v31 = vpack.i.bf16 %v1957_v63, %v2982_v51 }
 0x21e   : > { %2902 = vrot.lane.b32.xlu1 %v2901_v62, %s2988_s28  ;;  %2897 = vrot.lane.b32.xlu0 %v2896_v7, %s2983_s16  ;;  %v2951_v11 = vpack.i.bf16 %v4019_v12, %v4006_v4  ;;  %v4035_v59 = vsel %vm1347_vm7, %v2008_v3, 0.0  ;;  %vm2213_vm0 = vcmask 392192   ;;  %vm2426_vm6 = vcmask 64512  }
 0x21f   : > { %v2961_v54 = vpack.i.bf16 %v4035_v59, %v3906_v23 }
 0x222   : > { %2912 = vrot.lane.b32.xlu1 %v2911_v48, %s2989_s10  ;;  %2907 = vrot.lane.b32.xlu0 %v2906_v16, %s2987_s27 }
 0x226   : > { %2922 = vrot.lane.b32.xlu1 %v2921_v45, %s2985_s14  ;;  %2917 = vrot.lane.b32.xlu0 %v2911_v48, %s2979_s11 }
 0x22a   : > { %2927 = vrot.lane.b32.xlu1 %v2926_v10, %s2984_s17  ;;  %2942 = vrot.lane.b32.xlu0 %v2941_v33, %s2989_s10 }
 0x22e   : > { %2932 = vrot.lane.b32.xlu1 %v2931_v6, %s2987_s27  ;;  %2952 = vrot.lane.b32.xlu0 %v2951_v11, %s2988_s28 }
 0x232   : > { %2937 = vrot.lane.b32.xlu1 %v2936_v8, %s2983_s16  ;;  %2957 = vrot.lane.b32.xlu0 %v2956_v53, %s2983_s16 }
 0x236   : > { %2947 = vrot.lane.b32.xlu1 %v2946_v31, %s2979_s11  ;;  %2061 = vrot.lane.b32.xlu0 %v4019_v12, %s2985_s14 }
 0x23a   : > { %2962 = vrot.lane.b32.xlu1 %v2961_v54, %s2988_s28  ;;  %2152 = vrot.lane.b32.xlu0 %v3872_v27, %s2984_s17 }
 0x23e   : > { %2967 = vrot.lane.b32.xlu1 %v2966_v56, %s2989_s10 }
 0x278   : > { %v2843_v43 = vpop.permute.xlu0 %2842 }
 0x279   : > { %v2845_v14 = vunpack.i.h.bf16 %v2843_v43  ;;  %v2844_v18 = vunpack.i.l.bf16 %v2843_v43 }
 0x27c   : > { %v2853_v30 = vpop.permute.xlu1 %2852  ;;  %v2848_v38 = vpop.permute.xlu0 %2847 }
 0x27d   : > { %v2850_v25 = vunpack.i.h.bf16 %v2848_v38  ;;  %v2849_v24 = vunpack.i.l.bf16 %v2848_v38  ;;  %v2855_v42 = vunpack.i.h.bf16 %v2853_v30  ;;  %v2854_v7 = vunpack.i.l.bf16 %v2853_v30 }
 0x27f   : > { %v2199_v2 = vsel %vm1254_vm4, %v3872_v27, %v2850_v25  ;;  %v2198_v23 = vsel %vm1254_vm4, %v1935_v15, %v2849_v24 }
 0x280   : > { %v2858_v1 = vpop.permute.xlu1 %2857  ;;  %v2868_v19 = vpop.permute.xlu0 %2867  ;;  %v2207_v32 = vsel %vm1557_vm8, %v2199_v2, %v2855_v42  ;;  %v2206_v17 = vsel %vm1557_vm8, %v2198_v23, %v2854_v7 }
 0x281   : > { %v2869_v41 = vunpack.i.l.bf16 %v2868_v19  ;;  %v2215_v27 = vsel %vm2213_vm0, %v2206_v17, %v2844_v18  ;;  %v2216_v36 = vsel %vm2213_vm0, %v2207_v32, %v2845_v14  ;;  %v2870_v55 = vunpack.i.h.bf16 %v2868_v19 }
 0x282   : > { %v2859_v47 = vunpack.i.l.bf16 %v2858_v1  ;;  %v2860_v29 = vunpack.i.h.bf16 %v2858_v1 }
 0x284   : > { %v2863_v28 = vpop.permute.xlu1 %2862  ;;  %v2878_v37 = vpop.permute.xlu0 %2877 }
 0x285   : > { %v2865_v46 = vunpack.i.h.bf16 %v2863_v28  ;;  %v2864_v52 = vunpack.i.l.bf16 %v2863_v28  ;;  %v2879_v39 = vunpack.i.l.bf16 %v2878_v37  ;;  %v2880_v53 = vunpack.i.h.bf16 %v2878_v37 }
 0x287   : > { %v2224_v34 = vsel %vm1566_vm9, %v2216_v36, %v2865_v46  ;;  %v2223_v48 = vsel %vm1566_vm9, %v2215_v27, %v2864_v52 }
 0x288   : > { %v2232_v22 = vsel %vm2230_vm1, %v2223_v48, %v2869_v41  ;;  %v2873_v61 = vpop.permute.xlu1 %2872  ;;  %v2888_v57 = vpop.permute.xlu0 %2887  ;;  %v2233_v5 = vsel %vm2230_vm1, %v2224_v34, %v2870_v55 }
 0x289   : > { %v2240_v62 = vsel %vm1575_vm10, %v2232_v22, %v2859_v47  ;;  %v2241_v8 = vsel %vm1575_vm10, %v2233_v5, %v2860_v29  ;;  %v2890_v45 = vunpack.i.h.bf16 %v2888_v57  ;;  %v2889_v9 = vunpack.i.l.bf16 %v2888_v57 }
 0x28a   : > { %v2249_v63 = vsel %vm2247_vm5, %v2240_v62, %v2879_v39  ;;  %v2250_v6 = vsel %vm2247_vm5, %v2241_v8, %v2880_v53  ;;  %v2875_v11 = vunpack.i.h.bf16 %v2873_v61  ;;  %v2874_v31 = vunpack.i.l.bf16 %v2873_v61 }
 0x28b   : > { %2367 = vmatmul.mubr.f32.vlgmr.msra.gmra.mrb[8].mxu1 %v2249_v63 }
 0x28c   : > { %v2883_v13 = vpop.permute.xlu1 %2882  ;;  %v2893_v33 = vpop.permute.xlu0 %2892  ;;  %2524 = vmatprep.mubr.msk.f32.mxu1 %vm1254_vm4, %v3954_v44 }
 0x28d   : > { %v2885_v3 = vunpack.i.h.bf16 %v2883_v13  ;;  %v2884_v16 = vunpack.i.l.bf16 %v2883_v13  ;;  %v2894_v1 = vunpack.i.l.bf16 %v2893_v33  ;;  %v2895_v17 = vunpack.i.h.bf16 %v2893_v33 }
 0x28f   : > { %v2201_v10 = vsel %vm1254_vm4, %v3922_v58, %v2885_v3  ;;  %v2200_v15 = vsel %vm1254_vm4, %v3895_v21, %v2884_v16  ;;  %2372 = vmatmul.mubr.f32.gmra.mrb[10].mxu1 %v2250_v6 }
 0x290   : > { %v2209_v54 = vsel %vm1557_vm8, %v2201_v10, %v2890_v45  ;;  %v2208_v56 = vsel %vm1557_vm8, %v2200_v15, %v2889_v9  ;;  %v2903_v44 = vpop.permute.xlu1 %2902  ;;  %v2898_v43 = vpop.permute.xlu0 %2897  ;;  %2525 = vmatprep.mubr.msk.f32.mxu1 %vm1254_vm4, %v3984_v60 }
 0x291   : > { %v2900_v30 = vunpack.i.h.bf16 %v2898_v43  ;;  %v2899_v38 = vunpack.i.l.bf16 %v2898_v43  ;;  %v2904_v58 = vunpack.i.l.bf16 %v2903_v44  ;;  %v2217_v25 = vsel %vm2213_vm0, %v2208_v56, %v2874_v31 }
 0x292   : > { %v2218_v21 = vsel %vm2213_vm0, %v2209_v54, %v2875_v11  ;;  %v2905_v24 = vunpack.i.h.bf16 %v2903_v44 }
 0x293   : > { %v2225_v2 = vsel %vm1566_vm9, %v2217_v25, %v2899_v38  ;;  %v2226_v23 = vsel %vm1566_vm9, %v2218_v21, %v2900_v30 }
 0x294   : > { %v2913_v19 = vpop.permute.xlu1 %2912  ;;  %v2908_v42 = vpop.permute.xlu0 %2907  ;;  %v2234_v7 = vsel %vm2230_vm1, %v2225_v2, %v2904_v58  ;;  %v2235_v60 = vsel %vm2230_vm1, %v2226_v23, %v2905_v24 }
 0x295   : > { %v2914_v32 = vunpack.i.l.bf16 %v2913_v19  ;;  %v2242_v14 = vsel %vm1575_vm10, %v2234_v7, %v2894_v1  ;;  %v2915_v18 = vunpack.i.h.bf16 %v2913_v19  ;;  %v2243_v52 = vsel %vm1575_vm10, %v2235_v60, %v2895_v17 }
 0x296   : > { %v2910_v29 = vunpack.i.h.bf16 %v2908_v42  ;;  %v2909_v62 = vunpack.i.l.bf16 %v2908_v42 }
 0x297   : > { %v2251_v28 = vsel %vm2247_vm5, %v2242_v14, %v2914_v32  ;;  %v2252_v41 = vsel %vm2247_vm5, %v2243_v52, %v2915_v18 }
 0x298   : > { %v2923_v37 = vpop.permute.xlu1 %2922  ;;  %2377 = vmatmul.mubr.f32.gmra.mrb[12].mxu1 %v2251_v28  ;;  %v2918_v46 = vpop.permute.xlu0 %2917 }
 0x299   : > { %2526 = vmatprep.mubr.msk.f32.mxu1 %vm1254_vm4, %v4006_v4  ;;  %v2920_v27 = vunpack.i.h.bf16 %v2918_v46  ;;  %v2919_v36 = vunpack.i.l.bf16 %v2918_v46  ;;  %v2925_v57 = vunpack.i.h.bf16 %v2923_v37  ;;  %v2924_v4 = vunpack.i.l.bf16 %v2923_v37 }
 0x29b   : > { %v2203_v48 = vsel %vm1254_vm4, %v3973_v20, %v2920_v27  ;;  %v2202_v47 = vsel %vm1254_vm4, %v3950_v35, %v2919_v36 }
 0x29c   : > { %v2928_v55 = vpop.permute.xlu1 %2927  ;;  %2382 = vmatmul.mubr.f32.gmra.mrb[14].mxu1 %v2252_v41  ;;  %v2943_v34 = vpop.permute.xlu0 %2942  ;;  %v2210_v39 = vsel %vm1557_vm8, %v2202_v47, %v2924_v4  ;;  %v2211_v5 = vsel %vm1557_vm8, %v2203_v48, %v2925_v57 }
 0x29d   : > { %2527 = vmatprep.mubr.msk.f32.mxu1 %vm1254_vm4, %v4019_v12  ;;  %v2219_v20 = vsel %vm2213_vm0, %v2210_v39, %v2909_v62  ;;  %v2220_v35 = vsel %vm2213_vm0, %v2211_v5, %v2910_v29  ;;  %v2929_v3 = vunpack.i.l.bf16 %v2928_v55  ;;  %v2944_v9 = vunpack.i.l.bf16 %v2943_v34 }
 0x29e   : > { %v2930_v11 = vunpack.i.h.bf16 %v2928_v55  ;;  %v2945_v44 = vunpack.i.h.bf16 %v2943_v34  ;;  %v2521_v55 = vld [vmem:[%s4159_s5] ss:$0 sm:$0xff] }
 0x2a0   : > { %v2933_v22 = vpop.permute.xlu1 %2932  ;;  %v2953_v61 = vpop.permute.xlu0 %2952 }
 0x2a1   : > { %v2955_v8 = vunpack.i.h.bf16 %v2953_v61  ;;  %v2954_v53 = vunpack.i.l.bf16 %v2953_v61  ;;  %v2935_v43 = vunpack.i.h.bf16 %v2933_v22  ;;  %v2934_v38 = vunpack.i.l.bf16 %v2933_v22 }
 0x2a4   : > { %v2938_v63 = vpop.permute.xlu1 %2937  ;;  %v2958_v12 = vpop.permute.xlu0 %2957 }
 0x2a5   : > { %v2940_v13 = vunpack.i.h.bf16 %v2938_v63  ;;  %v2939_v33 = vunpack.i.l.bf16 %v2938_v63  ;;  %v2960_v2 = vunpack.i.h.bf16 %v2958_v12  ;;  %v2959_v23 = vunpack.i.l.bf16 %v2958_v12 }
 0x2a7   : > { %v2227_v16 = vsel %vm1566_vm9, %v2219_v20, %v2939_v33  ;;  %v2228_v45 = vsel %vm1566_vm9, %v2220_v35, %v2940_v13 }
 0x2a8   : > { %v2948_v10 = vpop.permute.xlu1 %2947  ;;  %v2236_v15 = vsel %vm2230_vm1, %v2227_v16, %v2954_v53  ;;  %v2237_v6 = vsel %vm2230_vm1, %v2228_v45, %v2955_v8  ;;  %v2062_v25 = vpop.permute.xlu0 %2061 }
 0x2a9   : > { %v2950_v31 = vunpack.i.h.bf16 %v2948_v10  ;;  %v2949_v54 = vunpack.i.l.bf16 %v2948_v10  ;;  %v2244_v56 = vsel %vm1575_vm10, %v2236_v15, %v2929_v3  ;;  %v2245_v24 = vsel %vm1575_vm10, %v2237_v6, %v2930_v11 }
 0x2aa   : > { %v2253_v30 = vsel %vm2247_vm5, %v2244_v56, %v2944_v9  ;;  %v2254_v40 = vsel %vm2247_vm5, %v2245_v24, %v2945_v44 }
 0x2ab   : > { %v2197_v58 = vsel %vm1254_vm4, 0.0, %v2949_v54  ;;  %v2204_v21 = vsel %vm1254_vm4, %v3996_v0, %v2950_v31  ;;  %2387 = vmatmul.mubr.f32.gmra.mrb[16].mxu1 %v2253_v30 }
 0x2ac   : > { %v2205_v1 = vsel %vm1557_vm8, %v2197_v58, %v2765_v50  ;;  %v2212_v19 = vsel %vm1557_vm8, %v2204_v21, %v2062_v25  ;;  %v2963_v42 = vpop.permute.xlu1 %2962  ;;  %2528 = vmatprep.mubr.msk.f32.mxu1 %vm1254_vm4, %v4035_v59  ;;  %v2153_v59 = vpop.permute.xlu0 %2152 }
 0x2ad   : > { %v2214_v7 = vsel %vm2213_vm0, %v2205_v1, %v2934_v38  ;;  %v2221_v32 = vsel %vm2213_vm0, %v2212_v19, %v2935_v43  ;;  %v2965_v0 = vunpack.i.h.bf16 %v2963_v42  ;;  %v2964_v60 = vunpack.i.l.bf16 %v2963_v42 }
 0x2ae   : > { %v2229_v17 = vsel %vm1566_vm9, %v2221_v32, %v2960_v2  ;;  %v2222_v14 = vsel %vm1566_vm9, %v2214_v7, %v2959_v23 }
 0x2af   : > { %v2231_v50 = vsel %vm2230_vm1, %v2222_v14, %v2964_v60  ;;  %2392 = vmatmul.mubr.f32.gmra.mrb[18].mxu1 %v2254_v40  ;;  %v2238_v18 = vsel %vm2230_vm1, %v2229_v17, %v2965_v0 }
 0x2b0   : > { %v2968_v28 = vpop.permute.xlu1 %2967  ;;  %2396 = vmatprep.mubr.f32.mxu1 %v2982_v51  ;;  %v2239_v52 = vsel %vm1575_vm10, %v2231_v50, %v2153_v59  ;;  %v2246_v41 = vsel %vm1575_vm10, %v2238_v18, %v2839_v26 }
 0x2b1   : > { %v2970_v37 = vunpack.i.h.bf16 %v2968_v28  ;;  %v2969_v46 = vunpack.i.l.bf16 %v2968_v28 }
 0x2b3   : > { %v2248_v27 = vsel %vm2247_vm5, %v2239_v52, %v2969_v46  ;;  %v2255_v36 = vsel %vm2247_vm5, %v2246_v41, %v2970_v37 }
 0x2b4   : > { %2362 = vmatmul.mubr.f32.vlgmr.msra.gmra.mrb[16].mxu0 %v2248_v27  ;;  %2397 = vmatmul.mubr.f32.gmra.mrb[20].mxu1 %v2255_v36 }
 0x35e   : > { %v2368_v51 = vpop.f32.mrb[8].mxu1 }
 0x35f   : > { %v2369_v34 = vadd.f32 %v2521_v55, %v2368_v51  ;;  %v2370_v48 = vpop.f32.mrb[9].mxu1 }
 0x361   : > { %vm2403_vm4 = vcmp.ge.f32.partialorder %v2369_v34, 0.0  ;;  %v2411_v49 = vmul.f32 0.01, %v2369_v34 }
 0x362   : > { %v2373_v26 = vpop.f32.mrb[10].mxu1 }
 0x363   : > { %v2419_v47 = vsel %vm2403_vm4, %v2369_v34, %v2411_v49  ;;  %v2374_v22 = vadd.f32 %v2521_v55, %v2373_v26  ;;  %v2375_v61 = vpop.f32.mrb[11].mxu1 }
 0x364   : > { %2428 = vst.msk [vmem:[%s4133_s12 + $0x8] sm:$0xff] %vm2426_vm6, %v2419_v47 }
 0x365   : > { %vm2404_vm7 = vcmp.ge.f32.partialorder %v2374_v22, 0.0  ;;  %v2412_v57 = vmul.f32 0.01, %v2374_v22 }
 0x367   : > { %v2420_v4 = vsel %vm2404_vm7, %v2374_v22, %v2412_v57 }
 0x368   : > { %2429 = vst.msk [vmem:[%s4133_s12 + $0x10] sm:$0xff] %vm2426_vm6, %v2420_v4 }
 0x36b   : > { %v2378_v39 = vpop.f32.mrb[12].mxu1 }
 0x36c   : > { %v2379_v5 = vadd.f32 %v2521_v55, %v2378_v39  ;;  %v2380_v29 = vpop.f32.mrb[13].mxu1 }
 0x36e   : > { %vm2405_vm8 = vcmp.ge.f32.partialorder %v2379_v5, 0.0  ;;  %v2413_v62 = vmul.f32 0.01, %v2379_v5 }
 0x36f   : > { %v2383_v63 = vpop.f32.mrb[14].mxu1 }
 0x370   : > { %v2421_v13 = vsel %vm2405_vm8, %v2379_v5, %v2413_v62  ;;  %v2384_v33 = vadd.f32 %v2521_v55, %v2383_v63  ;;  %v2385_v12 = vpop.f32.mrb[15].mxu1 }
 0x371   : > { %2430 = vst.msk [vmem:[%s4133_s12 + $0x18] sm:$0xff] %vm2426_vm6, %v2421_v13 }
 0x372   : > { %vm2406_vm9 = vcmp.ge.f32.partialorder %v2384_v33, 0.0  ;;  %v2414_v8 = vmul.f32 0.01, %v2384_v33 }
 0x374   : > { %v2422_v53 = vsel %vm2406_vm9, %v2384_v33, %v2414_v8 }
 0x375   : > { %2431 = vst.msk [vmem:[%s4133_s12 + $0x20] sm:$0xff] %vm2426_vm6, %v2422_v53 }
 0x37e   : > { %v2388_v20 = vpop.f32.mrb[16].mxu1 }
 0x37f   : > { %v2389_v35 = vadd.f32 %v2521_v55, %v2388_v20  ;;  %v2390_v3 = vpop.f32.mrb[17].mxu1 }
 0x381   : > { %vm2407_vm10 = vcmp.ge.f32.partialorder %v2389_v35, 0.0  ;;  %v2415_v16 = vmul.f32 0.01, %v2389_v35 }
 0x382   : > { %v2393_v45 = vpop.f32.mrb[18].mxu1 }
 0x383   : > { %v2423_v9 = vsel %vm2407_vm10, %v2389_v35, %v2415_v16  ;;  %v2394_v10 = vadd.f32 %v2521_v55, %v2393_v45  ;;  %v2395_v15 = vpop.f32.mrb[19].mxu1 }
 0x384   : > { %2432 = vst.msk [vmem:[%s4133_s12 + $0x28] sm:$0xff] %vm2426_vm6, %v2423_v9 }
 0x385   : > { %vm2408_vm12 = vcmp.ge.f32.partialorder %v2394_v10, 0.0  ;;  %v2416_v6 = vmul.f32 0.01, %v2394_v10 }
 0x387   : > { %v2424_v11 = vsel %vm2408_vm12, %v2394_v10, %v2416_v6  ;;  %v2363_v31 = vpop.f32.mrb[16].mxu0  ;;  %v2398_v54 = vpop.f32.mrb[20].mxu1 }
 0x388   : > { %2433 = vst.msk [vmem:[%s4133_s12 + $0x30] sm:$0xff] %vm2426_vm6, %v2424_v11  ;;  %v2364_v56 = vadd.f32 %v2521_v55, %v2363_v31  ;;  %v2399_v44 = vadd.f32 %v2521_v55, %v2398_v54  ;;  %v2365_v43 = vpop.f32.mrb[17].mxu0  ;;  %v2400_v30 = vpop.f32.mrb[21].mxu1 }
 0x38a   : > { %vm2402_vm13 = vcmp.ge.f32.partialorder %v2364_v56, 0.0  ;;  %v2410_v38 = vmul.f32 0.01, %v2364_v56  ;;  %vm2409_vm14 = vcmp.ge.f32.partialorder %v2399_v44, 0.0  ;;  %v2417_v58 = vmul.f32 0.01, %v2399_v44 }
 0x38c   : > { %v2418_v25 = vsel %vm2402_vm13, %v2364_v56, %v2410_v38  ;;  %v2425_v21 = vsel %vm2409_vm14, %v2399_v44, %v2417_v58 }
 0x38d   : > { %2427 = vst.msk [vmem:[%s4133_s12] sm:$0xff] %vm2426_vm6, %v2418_v25  ;;  %2434 = vst.msk [vmem:[%s4133_s12 + $0x38] sm:$0xff] %vm2426_vm6, %v2425_v21 }
 0x38e PF: > { %s16_s21 = sadd.s32 1, %s2977_s21  }
 0x38f   : > { %p13_p4 = scmp.ge.s32.totalorder %s16_s21, 4  }
 0x391   :  { %15 = sbr.rel (!%p13_p4) target bundleno = 1 (0x1), region = 77 }

</bundles_post_ra>
